<compile_context>
chip_gen: v7x
topology: tpu7x:2x2x1
jax: 0.10.0
libtpu: 0.0.40
codegen_flags: <defaults>
</compile_context>

<pallas_src>
import functools

import jax
import jax.numpy as jnp
from jax.experimental import pallas as pl
from jax.experimental.pallas import tpu as pltpu

# ----------------------------- configuration -------------------------------
STATIC_DIM = 16     # static_dim
SEQ_FEAT = 8        # seq_feature_dim
HORIZON = 4         # output_horizon
OUT_DIM = 3         # output_dim
HIDDEN = 32         # hidden_dim
GRU_LAYERS = 2
BATCH = 2
SEQ_LEN = 8

PRED_OUT = HORIZON * OUT_DIM          # 12
LANE_PAD = 128                        # lane-dense padded slab width

_VMEM = pl.BlockSpec(memory_space=pltpu.MemorySpace.VMEM)

# Row layout of the packed weight slab (all row counts are multiples of 8, so
# every sub-array starts on a sublane-aligned offset).
_W_ROWS = {}
_off = 0
for _name, _rows in (("se_w1", STATIC_DIM), ("se_w2", HIDDEN), ("w0_i", SEQ_FEAT),
                     ("w0_h", HIDDEN), ("w1", 2 * HIDDEN), ("pw1_s", HIDDEN),
                     ("pw1_d", HIDDEN), ("pw2", HIDDEN)):
    _W_ROWS[_name] = (_off, _off + _rows)
    _off += _rows
W_SLAB_ROWS = _off                    # 248

# Row layout of the packed bias slab (one (8,128) vreg).
_B_ROW = {"se_b1": 0, "se_b2": 1, "b0_i": 2, "b0_h": 3, "b1": 4, "pb1": 5, "pb2": 6}


def _dot(a, b):
    return jnp.dot(a, b, preferred_element_type=jnp.float32)


def _sigmoid(x):
    # sigmoid(x) == 0.5*(tanh(x/2)+1): one EUP push instead of exp+reciprocal.
    return 0.5 * jnp.tanh(0.5 * x) + 0.5


# --------------------------- fused forward kernel ---------------------------
def dynamics_kernel(static_ref, seq_tm_ref, w_ref, b_ref, out_ref,
                    *, seq_len, batch, hidden):
    H = hidden
    B = batch
    H2 = 2 * H
    H3 = 3 * H

    # Bias slab: a single (8,128) vreg; static row slices below are free.
    b = b_ref[...]
    se_b1 = b[_B_ROW["se_b1"]:_B_ROW["se_b1"] + 1, :H]
    se_b2 = b[_B_ROW["se_b2"]:_B_ROW["se_b2"] + 1, :H]
    b0_i = b[_B_ROW["b0_i"]:_B_ROW["b0_i"] + 1, :H3]
    b0_h = b[_B_ROW["b0_h"]:_B_ROW["b0_h"] + 1, :H3]
    b1 = b[_B_ROW["b1"]:_B_ROW["b1"] + 1, :]
    pb1 = b[_B_ROW["pb1"]:_B_ROW["pb1"] + 1, :H]
    pb2 = b[_B_ROW["pb2"]:_B_ROW["pb2"] + 1, :]

    def w(name, cols):
        lo, hi = _W_ROWS[name]
        return w_ref[lo:hi, :cols]

    # ---- static encoder: Linear -> ReLU -> Linear (off the critical path) ----
    hs = jnp.maximum(_dot(static_ref[...], w("se_w1", H)) + se_b1, 0.0)
    static_feat = _dot(hs, w("se_w2", H)) + se_b2

    # ---- GRU layer 0: input projection hoisted over all timesteps ----------
    # seq_tm_ref is (T*B, F), rows ordered time-major; timestep t is the
    # contiguous row block [t*B, (t+1)*B).  Columns: [rz (2H) | n (H)],
    # rz biases (input+hidden) pre-summed, n input bias included.
    gi0 = _dot(seq_tm_ref[...], w("w0_i", H3)) + b0_i        # (T*B, 3H)

    # Recurrent block weights (12 vregs total after fusion), loaded once.
    w0_h = w("w0_h", H3)          # (H, 3H)  = [w_hrz | w_hn]
    w1 = w("w1", 4 * H)           # (2H, 4H) block weight for layer 1

    h0 = jnp.zeros((B, H), jnp.float32)
    h1 = jnp.zeros((B, H), jnp.float32)

    # Trace-time unrolled time loop: 2 serial MXU pushes per step.
    for t in range(seq_len):
        lo = t * B
        g0 = gi0[lo:lo + B, :]
        # ---- layer 0: ONE hidden matmul; lanes 0:2H = rz term, 2H:3H = n term
        hid0 = _dot(h0, w0_h) + b0_h                          # (B, 3H)
        rz0 = _sigmoid(g0[:, :H2] + hid0[:, :H2])
        r0 = rz0[:, :H]
        z0 = rz0[:, H:]
        n0 = jnp.tanh(g0[:, H2:] + r0 * hid0[:, H2:])         # b_hn inside r*(.)
        h0 = (1.0 - z0) * n0 + z0 * h0

        # ---- layer 1: ONE block matmul on [h0 | h1]
        # lanes 0:2H  = gi_rz + gh_rz (+ fused rz biases)
        # lanes 2H:3H = gi_n (+ b_ih_n)
        # lanes 3H:4H = gh_n (+ b_hh_n)
        hcat = jnp.concatenate([h0, h1], axis=1)              # (B, 2H)
        g1 = _dot(hcat, w1) + b1                              # (B, 4H)
        rz1 = _sigmoid(g1[:, :H2])
        r1 = rz1[:, :H]
        z1 = rz1[:, H:]
        n1 = jnp.tanh(g1[:, H2:H3] + r1 * g1[:, H3:])
        h1 = (1.0 - z1) * n1 + z1 * h1

    # ---- predictor on concat([static_feat, h1]) via split first layer ------
    p = jnp.maximum(_dot(static_feat, w("pw1_s", H))
                    + _dot(h1, w("pw1_d", H)) + pb1, 0.0)
    out = _dot(p, w("pw2", LANE_PAD)) + pb2                   # (B, 128) lane-dense
    out_ref[...] = out.astype(out_ref.dtype)


# ------------------------------- JAX wrapper ---------------------------------
@jax.jit
def dynamics_gru_forward(static_input, sequence_input, kp):
    b, t, f = sequence_input.shape
    # Time-major 2-D layout so every per-timestep access in the kernel is a
    # contiguous static sublane slice (tiny 512 B relayout, done inside jit).
    seq_tm = jnp.transpose(sequence_input, (1, 0, 2)).reshape(t * b, f)

    kernel = functools.partial(dynamics_kernel, seq_len=t, batch=b, hidden=HIDDEN)
    padded = pl.pallas_call(
        kernel,
        out_shape=jax.ShapeDtypeStruct((b, LANE_PAD), jnp.float32),
        in_specs=[_VMEM, _VMEM, _VMEM, _VMEM],
        out_specs=_VMEM,
    )(static_input, seq_tm, kp["w"], kp["b"])
    return padded[:, :PRED_OUT].reshape(-1, HORIZON, OUT_DIM)


# --------------------------- parameter construction --------------------------
def init_params(key):
    """Canonical layout: Linear weights (in, out); GRU gates concatenated r|z|n."""
    ks = jax.random.split(key, 16)
    k_iter = iter(ks)

    def u(shape, fan_in):
        bound = 1.0 / jnp.sqrt(jnp.float32(fan_in))
        return jax.random.uniform(next(k_iter), shape, jnp.float32, -bound, bound)

    p = {}
    # static_encoder: Linear(static, H) -> ReLU -> Linear(H, H)
    p["se_w1"] = u((STATIC_DIM, HIDDEN), STATIC_DIM)
    p["se_b1"] = u((1, HIDDEN), STATIC_DIM)
    p["se_w2"] = u((HIDDEN, HIDDEN), HIDDEN)
    p["se_b2"] = u((1, HIDDEN), HIDDEN)
    # GRU layer 0 (input = SEQ_FEAT) and layer 1 (input = HIDDEN); gate order r,z,n
    p["wih0"] = u((SEQ_FEAT, 3 * HIDDEN), HIDDEN)
    p["whh0"] = u((HIDDEN, 3 * HIDDEN), HIDDEN)
    p["bih0"] = u((1, 3 * HIDDEN), HIDDEN)
    p["bhh0"] = u((1, 3 * HIDDEN), HIDDEN)
    p["wih1"] = u((HIDDEN, 3 * HIDDEN), HIDDEN)
    p["whh1"] = u((HIDDEN, 3 * HIDDEN), HIDDEN)
    p["bih1"] = u((1, 3 * HIDDEN), HIDDEN)
    p["bhh1"] = u((1, 3 * HIDDEN), HIDDEN)
    # predictor: Linear(2H, H) -> ReLU -> Linear(H, HORIZON*OUT_DIM)
    p["pr_w1"] = u((2 * HIDDEN, HIDDEN), 2 * HIDDEN)
    p["pr_b1"] = u((1, HIDDEN), 2 * HIDDEN)
    p["pr_w2"] = u((HIDDEN, PRED_OUT), HIDDEN)
    p["pr_b2"] = u((1, PRED_OUT), HIDDEN)
    return p


def to_kernel_params(p):
    """Pack canonical params into two 128-lane slabs (done once at init)."""
    H = HIDDEN

    def padw(a):
        return jnp.pad(a, ((0, 0), (0, LANE_PAD - a.shape[1])))

    # Layer 0: input projection weight keeps native (F, 3H) gate layout r|z|n;
    # rz input+hidden biases pre-summed, n hidden bias goes on the hidden slab.
    w0_i = p["wih0"]                                               # (F, 3H)
    b0_i = jnp.concatenate([p["bih0"][:, :2 * H] + p["bhh0"][:, :2 * H],
                            p["bih0"][:, 2 * H:]], axis=1)         # (1, 3H)
    w0_h = p["whh0"]                                               # (H, 3H) = [hrz | hn]
    b0_h = jnp.concatenate([jnp.zeros((1, 2 * H), jnp.float32),
                            p["bhh0"][:, 2 * H:]], axis=1)         # (1, 3H)

    # Layer 1 block weight (2H, 4H):
    #   rows 0:H  (h0) = [w_irz | w_in | 0   ]
    #   rows H:2H (h1) = [w_hrz | 0    | w_hn]
    zeros_hh = jnp.zeros((H, H), jnp.float32)
    w1_top = jnp.concatenate([p["wih1"][:, :2 * H], p["wih1"][:, 2 * H:], zeros_hh], axis=1)
    w1_bot = jnp.concatenate([p["whh1"][:, :2 * H], zeros_hh, p["whh1"][:, 2 * H:]], axis=1)
    w1 = jnp.concatenate([w1_top, w1_bot], axis=0)                 # (2H, 4H)
    b1 = jnp.concatenate([p["bih1"][:, :2 * H] + p["bhh1"][:, :2 * H],
                          p["bih1"][:, 2 * H:], p["bhh1"][:, 2 * H:]], axis=1)  # (1, 4H)

    weight_slab = jnp.concatenate([
        padw(p["se_w1"]),          # rows   0: 16
        padw(p["se_w2"]),          #       16: 48
        padw(w0_i),                #       48: 56
        padw(w0_h),                #       56: 88
        w1,                        #       88:152
        padw(p["pr_w1"][:H]),      #      152:184  (acts on static_feat)
        padw(p["pr_w1"][H:]),      #      184:216  (acts on dynamic_feat)
        padw(p["pr_w2"]),          #      216:248  (lane-padded -> full vst)
    ], axis=0)
    assert weight_slab.shape == (W_SLAB_ROWS, LANE_PAD)

    bias_slab = jnp.concatenate([
        padw(p["se_b1"]), padw(p["se_b2"]),
        padw(b0_i), padw(b0_h), b1,
        padw(p["pr_b1"]), padw(p["pr_b2"]),
        jnp.zeros((1, LANE_PAD), jnp.float32),
    ], axis=0)                                                     # (8, 128)
    return {"w": weight_slab, "b": bias_slab}


# ------------------------------ pure-JAX reference ---------------------------
def reference_forward(static_input, sequence_input, p):
    static_feat = jnp.maximum(static_input @ p["se_w1"] + p["se_b1"], 0.0)
    static_feat = static_feat @ p["se_w2"] + p["se_b2"]

    def cell(x, h, wih, whh, bih, bhh):
        gi = x @ wih + bih
        gh = h @ whh + bhh
        r = jax.nn.sigmoid(gi[:, :HIDDEN] + gh[:, :HIDDEN])
        z = jax.nn.sigmoid(gi[:, HIDDEN:2 * HIDDEN] + gh[:, HIDDEN:2 * HIDDEN])
        n = jnp.tanh(gi[:, 2 * HIDDEN:] + r * gh[:, 2 * HIDDEN:])
        return (1.0 - z) * n + z * h

    h0 = jnp.zeros((sequence_input.shape[0], HIDDEN), jnp.float32)
    h1 = jnp.zeros_like(h0)
    for t in range(sequence_input.shape[1]):
        h0 = cell(sequence_input[:, t], h0, p["wih0"], p["whh0"], p["bih0"], p["bhh0"])
        h1 = cell(h0, h1, p["wih1"], p["whh1"], p["bih1"], p["bhh1"])

    fused = jnp.concatenate([static_feat, h1], axis=-1)
    out = jnp.maximum(fused @ p["pr_w1"] + p["pr_b1"], 0.0)
    out = out @ p["pr_w2"] + p["pr_b2"]
    return out.reshape(-1, HORIZON, OUT_DIM)


# ----------------------------------- main ------------------------------------
if __name__ == "__main__":
    key = jax.random.PRNGKey(0)
    k_param, k_static, k_seq = jax.random.split(key, 3)

    params = init_params(k_param)
    kparams = to_kernel_params(params)

    static_x = jax.random.normal(k_static, (BATCH, STATIC_DIM), jnp.float32)
    seq_x = jax.random.normal(k_seq, (BATCH, SEQ_LEN, SEQ_FEAT), jnp.float32)

    out = dynamics_gru_forward(static_x, seq_x, kparams)
    out = jax.block_until_ready(out)

    ref = reference_forward(static_x, seq_x, params)
    assert out.shape == (BATCH, HORIZON, OUT_DIM), out.shape
    assert jnp.allclose(out, ref, rtol=1e-4, atol=1e-4), "mismatch vs JAX reference"

    print("KERNEL_OK")
</pallas_src>

<mosaic_0001>
module attributes {stable_mosaic.version = 11 : i64} {
  func.func @dynamics_kernel(%arg0: memref<2x16xf32, #tpu.memory_space<vmem>>, %arg1: memref<16x8xf32, #tpu.memory_space<vmem>>, %arg2: memref<248x128xf32, #tpu.memory_space<vmem>>, %arg3: memref<8x128xf32, #tpu.memory_space<vmem>>, %arg4: memref<2x128xf32, #tpu.memory_space<vmem>>) attributes {dimension_semantics = [], scalar_prefetch = 0 : i64, scratch_operands = 0 : i64, tpu.core_type = #tpu.core_type<tc>} {
    %c0 = arith.constant 0 : index
    %c0_0 = arith.constant 0 : index
    %0 = vector.load %arg3[%c0, %c0_0] : memref<8x128xf32, #tpu.memory_space<vmem>>, vector<8x128xf32>
    %1 = vector.extract_strided_slice %0 {offsets = [0, 0], sizes = [1, 32], strides = [1, 1]} : vector<8x128xf32> to vector<1x32xf32>
    %2 = vector.extract_strided_slice %0 {offsets = [1, 0], sizes = [1, 32], strides = [1, 1]} : vector<8x128xf32> to vector<1x32xf32>
    %3 = vector.extract_strided_slice %0 {offsets = [2, 0], sizes = [1, 96], strides = [1, 1]} : vector<8x128xf32> to vector<1x96xf32>
    %4 = vector.extract_strided_slice %0 {offsets = [3, 0], sizes = [1, 96], strides = [1, 1]} : vector<8x128xf32> to vector<1x96xf32>
    %5 = vector.extract_strided_slice %0 {offsets = [4, 0], sizes = [1, 128], strides = [1, 1]} : vector<8x128xf32> to vector<1x128xf32>
    %6 = vector.extract_strided_slice %0 {offsets = [5, 0], sizes = [1, 32], strides = [1, 1]} : vector<8x128xf32> to vector<1x32xf32>
    %7 = vector.extract_strided_slice %0 {offsets = [6, 0], sizes = [1, 128], strides = [1, 1]} : vector<8x128xf32> to vector<1x128xf32>
    %c0_1 = arith.constant 0 : index
    %c0_2 = arith.constant 0 : index
    %8 = vector.load %arg0[%c0_1, %c0_2] : memref<2x16xf32, #tpu.memory_space<vmem>>, vector<2x16xf32>
    %c0_3 = arith.constant 0 : index
    %c0_4 = arith.constant 0 : index
    %9 = vector.load %arg2[%c0_3, %c0_4] : memref<248x128xf32, #tpu.memory_space<vmem>>, vector<16x32xf32>
    %cst = arith.constant dense<0.000000e+00> : vector<2x32xf32>
    %10 = tpu.matmul %8, %9, %cst {dimension_numbers = #tpu.dot_dimension_numbers<[1], [0], [0], [1], [0, 0, 1, 1], [], []>} : vector<2x16xf32>, vector<16x32xf32>, vector<2x32xf32> -> vector<2x32xf32>
    %11 = vector.broadcast %1 : vector<1x32xf32> to vector<2x32xf32>
    %12 = arith.addf %10, %11 : vector<2x32xf32>
    %cst_5 = arith.constant 0.000000e+00 : f32
    %13 = vector.broadcast %cst_5 : f32 to vector<2x32xf32>
    %14 = arith.maximumf %12, %13 : vector<2x32xf32>
    %c16 = arith.constant 16 : index
    %c0_6 = arith.constant 0 : index
    %15 = vector.load %arg2[%c16, %c0_6] : memref<248x128xf32, #tpu.memory_space<vmem>>, vector<32x32xf32>
    %cst_7 = arith.constant dense<0.000000e+00> : vector<2x32xf32>
    %16 = tpu.matmul %14, %15, %cst_7 {dimension_numbers = #tpu.dot_dimension_numbers<[1], [0], [0], [1], [0, 0, 1, 1], [], []>} : vector<2x32xf32>, vector<32x32xf32>, vector<2x32xf32> -> vector<2x32xf32>
    %17 = vector.broadcast %2 : vector<1x32xf32> to vector<2x32xf32>
    %18 = arith.addf %16, %17 : vector<2x32xf32>
    %c0_8 = arith.constant 0 : index
    %c0_9 = arith.constant 0 : index
    %19 = vector.load %arg1[%c0_8, %c0_9] : memref<16x8xf32, #tpu.memory_space<vmem>>, vector<16x8xf32>
    %c48 = arith.constant 48 : index
    %c0_10 = arith.constant 0 : index
    %20 = vector.load %arg2[%c48, %c0_10] : memref<248x128xf32, #tpu.memory_space<vmem>>, vector<8x96xf32>
    %cst_11 = arith.constant dense<0.000000e+00> : vector<16x96xf32>
    %21 = tpu.matmul %19, %20, %cst_11 {dimension_numbers = #tpu.dot_dimension_numbers<[1], [0], [0], [1], [0, 0, 1, 1], [], []>} : vector<16x8xf32>, vector<8x96xf32>, vector<16x96xf32> -> vector<16x96xf32>
    %22 = vector.broadcast %3 : vector<1x96xf32> to vector<16x96xf32>
    %23 = arith.addf %21, %22 : vector<16x96xf32>
    %c56 = arith.constant 56 : index
    %c0_12 = arith.constant 0 : index
    %24 = vector.load %arg2[%c56, %c0_12] : memref<248x128xf32, #tpu.memory_space<vmem>>, vector<32x96xf32>
    %c88 = arith.constant 88 : index
    %c0_13 = arith.constant 0 : index
    %25 = vector.load %arg2[%c88, %c0_13] : memref<248x128xf32, #tpu.memory_space<vmem>>, vector<64x128xf32>
    %cst_14 = arith.constant 0.000000e+00 : f32
    %26 = vector.broadcast %cst_14 : f32 to vector<2x32xf32>
    %cst_15 = arith.constant 0.000000e+00 : f32
    %27 = vector.broadcast %cst_15 : f32 to vector<2x32xf32>
    %28 = vector.extract_strided_slice %23 {offsets = [0, 0], sizes = [2, 96], strides = [1, 1]} : vector<16x96xf32> to vector<2x96xf32>
    %cst_16 = arith.constant dense<0.000000e+00> : vector<2x96xf32>
    %29 = tpu.matmul %26, %24, %cst_16 {dimension_numbers = #tpu.dot_dimension_numbers<[1], [0], [0], [1], [0, 0, 1, 1], [], []>} : vector<2x32xf32>, vector<32x96xf32>, vector<2x96xf32> -> vector<2x96xf32>
    %30 = vector.broadcast %4 : vector<1x96xf32> to vector<2x96xf32>
    %31 = arith.addf %29, %30 : vector<2x96xf32>
    %32 = vector.extract_strided_slice %28 {offsets = [0, 0], sizes = [2, 64], strides = [1, 1]} : vector<2x96xf32> to vector<2x64xf32>
    %33 = vector.extract_strided_slice %31 {offsets = [0, 0], sizes = [2, 64], strides = [1, 1]} : vector<2x96xf32> to vector<2x64xf32>
    %34 = arith.addf %32, %33 : vector<2x64xf32>
    %cst_17 = arith.constant 5.000000e-01 : f32
    %35 = vector.broadcast %cst_17 : f32 to vector<2x64xf32>
    %36 = arith.mulf %35, %34 : vector<2x64xf32>
    %37 = math.tanh %36 : vector<2x64xf32>
    %cst_18 = arith.constant 5.000000e-01 : f32
    %38 = vector.broadcast %cst_18 : f32 to vector<2x64xf32>
    %39 = arith.mulf %38, %37 : vector<2x64xf32>
    %cst_19 = arith.constant 5.000000e-01 : f32
    %40 = vector.broadcast %cst_19 : f32 to vector<2x64xf32>
    %41 = arith.addf %39, %40 : vector<2x64xf32>
    %42 = vector.extract_strided_slice %41 {offsets = [0, 0], sizes = [2, 32], strides = [1, 1]} : vector<2x64xf32> to vector<2x32xf32>
    %43 = vector.extract_strided_slice %41 {offsets = [0, 32], sizes = [2, 32], strides = [1, 1]} : vector<2x64xf32> to vector<2x32xf32>
    %44 = vector.extract_strided_slice %28 {offsets = [0, 64], sizes = [2, 32], strides = [1, 1]} : vector<2x96xf32> to vector<2x32xf32>
    %45 = vector.extract_strided_slice %31 {offsets = [0, 64], sizes = [2, 32], strides = [1, 1]} : vector<2x96xf32> to vector<2x32xf32>
    %46 = arith.mulf %42, %45 : vector<2x32xf32>
    %47 = arith.addf %44, %46 : vector<2x32xf32>
    %48 = math.tanh %47 : vector<2x32xf32>
    %cst_20 = arith.constant 1.000000e+00 : f32
    %49 = vector.broadcast %cst_20 : f32 to vector<2x32xf32>
    %50 = arith.subf %49, %43 : vector<2x32xf32>
    %51 = arith.mulf %50, %48 : vector<2x32xf32>
    %52 = arith.mulf %43, %26 : vector<2x32xf32>
    %53 = arith.addf %51, %52 : vector<2x32xf32>
    %54 = tpu.concatenate %53, %27 in 1 : vector<2x32xf32>, vector<2x32xf32> -> vector<2x64xf32>
    %cst_21 = arith.constant dense<0.000000e+00> : vector<2x128xf32>
    %55 = tpu.matmul %54, %25, %cst_21 {dimension_numbers = #tpu.dot_dimension_numbers<[1], [0], [0], [1], [0, 0, 1, 1], [], []>} : vector<2x64xf32>, vector<64x128xf32>, vector<2x128xf32> -> vector<2x128xf32>
    %56 = vector.broadcast %5 : vector<1x128xf32> to vector<2x128xf32>
    %57 = arith.addf %55, %56 : vector<2x128xf32>
    %58 = vector.extract_strided_slice %57 {offsets = [0, 0], sizes = [2, 64], strides = [1, 1]} : vector<2x128xf32> to vector<2x64xf32>
    %cst_22 = arith.constant 5.000000e-01 : f32
    %59 = vector.broadcast %cst_22 : f32 to vector<2x64xf32>
    %60 = arith.mulf %59, %58 : vector<2x64xf32>
    %61 = math.tanh %60 : vector<2x64xf32>
    %cst_23 = arith.constant 5.000000e-01 : f32
    %62 = vector.broadcast %cst_23 : f32 to vector<2x64xf32>
    %63 = arith.mulf %62, %61 : vector<2x64xf32>
    %cst_24 = arith.constant 5.000000e-01 : f32
    %64 = vector.broadcast %cst_24 : f32 to vector<2x64xf32>
    %65 = arith.addf %63, %64 : vector<2x64xf32>
    %66 = vector.extract_strided_slice %65 {offsets = [0, 0], sizes = [2, 32], strides = [1, 1]} : vector<2x64xf32> to vector<2x32xf32>
    %67 = vector.extract_strided_slice %65 {offsets = [0, 32], sizes = [2, 32], strides = [1, 1]} : vector<2x64xf32> to vector<2x32xf32>
    %68 = vector.extract_strided_slice %57 {offsets = [0, 64], sizes = [2, 32], strides = [1, 1]} : vector<2x128xf32> to vector<2x32xf32>
    %69 = vector.extract_strided_slice %57 {offsets = [0, 96], sizes = [2, 32], strides = [1, 1]} : vector<2x128xf32> to vector<2x32xf32>
    %70 = arith.mulf %66, %69 : vector<2x32xf32>
    %71 = arith.addf %68, %70 : vector<2x32xf32>
    %72 = math.tanh %71 : vector<2x32xf32>
    %cst_25 = arith.constant 1.000000e+00 : f32
    %73 = vector.broadcast %cst_25 : f32 to vector<2x32xf32>
    %74 = arith.subf %73, %67 : vector<2x32xf32>
    %75 = arith.mulf %74, %72 : vector<2x32xf32>
    %76 = arith.mulf %67, %27 : vector<2x32xf32>
    %77 = arith.addf %75, %76 : vector<2x32xf32>
    %78 = vector.extract_strided_slice %23 {offsets = [2, 0], sizes = [2, 96], strides = [1, 1]} : vector<16x96xf32> to vector<2x96xf32>
    %cst_26 = arith.constant dense<0.000000e+00> : vector<2x96xf32>
    %79 = tpu.matmul %53, %24, %cst_26 {dimension_numbers = #tpu.dot_dimension_numbers<[1], [0], [0], [1], [0, 0, 1, 1], [], []>} : vector<2x32xf32>, vector<32x96xf32>, vector<2x96xf32> -> vector<2x96xf32>
    %80 = vector.broadcast %4 : vector<1x96xf32> to vector<2x96xf32>
    %81 = arith.addf %79, %80 : vector<2x96xf32>
    %82 = vector.extract_strided_slice %78 {offsets = [0, 0], sizes = [2, 64], strides = [1, 1]} : vector<2x96xf32> to vector<2x64xf32>
    %83 = vector.extract_strided_slice %81 {offsets = [0, 0], sizes = [2, 64], strides = [1, 1]} : vector<2x96xf32> to vector<2x64xf32>
    %84 = arith.addf %82, %83 : vector<2x64xf32>
    %cst_27 = arith.constant 5.000000e-01 : f32
    %85 = vector.broadcast %cst_27 : f32 to vector<2x64xf32>
    %86 = arith.mulf %85, %84 : vector<2x64xf32>
    %87 = math.tanh %86 : vector<2x64xf32>
    %cst_28 = arith.constant 5.000000e-01 : f32
    %88 = vector.broadcast %cst_28 : f32 to vector<2x64xf32>
    %89 = arith.mulf %88, %87 : vector<2x64xf32>
    %cst_29 = arith.constant 5.000000e-01 : f32
    %90 = vector.broadcast %cst_29 : f32 to vector<2x64xf32>
    %91 = arith.addf %89, %90 : vector<2x64xf32>
    %92 = vector.extract_strided_slice %91 {offsets = [0, 0], sizes = [2, 32], strides = [1, 1]} : vector<2x64xf32> to vector<2x32xf32>
    %93 = vector.extract_strided_slice %91 {offsets = [0, 32], sizes = [2, 32], strides = [1, 1]} : vector<2x64xf32> to vector<2x32xf32>
    %94 = vector.extract_strided_slice %78 {offsets = [0, 64], sizes = [2, 32], strides = [1, 1]} : vector<2x96xf32> to vector<2x32xf32>
    %95 = vector.extract_strided_slice %81 {offsets = [0, 64], sizes = [2, 32], strides = [1, 1]} : vector<2x96xf32> to vector<2x32xf32>
    %96 = arith.mulf %92, %95 : vector<2x32xf32>
    %97 = arith.addf %94, %96 : vector<2x32xf32>
    %98 = math.tanh %97 : vector<2x32xf32>
    %cst_30 = arith.constant 1.000000e+00 : f32
    %99 = vector.broadcast %cst_30 : f32 to vector<2x32xf32>
    %100 = arith.subf %99, %93 : vector<2x32xf32>
    %101 = arith.mulf %100, %98 : vector<2x32xf32>
    %102 = arith.mulf %93, %53 : vector<2x32xf32>
    %103 = arith.addf %101, %102 : vector<2x32xf32>
    %104 = tpu.concatenate %103, %77 in 1 : vector<2x32xf32>, vector<2x32xf32> -> vector<2x64xf32>
    %cst_31 = arith.constant dense<0.000000e+00> : vector<2x128xf32>
    %105 = tpu.matmul %104, %25, %cst_31 {dimension_numbers = #tpu.dot_dimension_numbers<[1], [0], [0], [1], [0, 0, 1, 1], [], []>} : vector<2x64xf32>, vector<64x128xf32>, vector<2x128xf32> -> vector<2x128xf32>
    %106 = vector.broadcast %5 : vector<1x128xf32> to vector<2x128xf32>
    %107 = arith.addf %105, %106 : vector<2x128xf32>
    %108 = vector.extract_strided_slice %107 {offsets = [0, 0], sizes = [2, 64], strides = [1, 1]} : vector<2x128xf32> to vector<2x64xf32>
    %cst_32 = arith.constant 5.000000e-01 : f32
    %109 = vector.broadcast %cst_32 : f32 to vector<2x64xf32>
    %110 = arith.mulf %109, %108 : vector<2x64xf32>
    %111 = math.tanh %110 : vector<2x64xf32>
    %cst_33 = arith.constant 5.000000e-01 : f32
    %112 = vector.broadcast %cst_33 : f32 to vector<2x64xf32>
    %113 = arith.mulf %112, %111 : vector<2x64xf32>
    %cst_34 = arith.constant 5.000000e-01 : f32
    %114 = vector.broadcast %cst_34 : f32 to vector<2x64xf32>
    %115 = arith.addf %113, %114 : vector<2x64xf32>
    %116 = vector.extract_strided_slice %115 {offsets = [0, 0], sizes = [2, 32], strides = [1, 1]} : vector<2x64xf32> to vector<2x32xf32>
    %117 = vector.extract_strided_slice %115 {offsets = [0, 32], sizes = [2, 32], strides = [1, 1]} : vector<2x64xf32> to vector<2x32xf32>
    %118 = vector.extract_strided_slice %107 {offsets = [0, 64], sizes = [2, 32], strides = [1, 1]} : vector<2x128xf32> to vector<2x32xf32>
    %119 = vector.extract_strided_slice %107 {offsets = [0, 96], sizes = [2, 32], strides = [1, 1]} : vector<2x128xf32> to vector<2x32xf32>
    %120 = arith.mulf %116, %119 : vector<2x32xf32>
    %121 = arith.addf %118, %120 : vector<2x32xf32>
    %122 = math.tanh %121 : vector<2x32xf32>
    %cst_35 = arith.constant 1.000000e+00 : f32
    %123 = vector.broadcast %cst_35 : f32 to vector<2x32xf32>
    %124 = arith.subf %123, %117 : vector<2x32xf32>
    %125 = arith.mulf %124, %122 : vector<2x32xf32>
    %126 = arith.mulf %117, %77 : vector<2x32xf32>
    %127 = arith.addf %125, %126 : vector<2x32xf32>
    %128 = vector.extract_strided_slice %23 {offsets = [4, 0], sizes = [2, 96], strides = [1, 1]} : vector<16x96xf32> to vector<2x96xf32>
    %cst_36 = arith.constant dense<0.000000e+00> : vector<2x96xf32>
    %129 = tpu.matmul %103, %24, %cst_36 {dimension_numbers = #tpu.dot_dimension_numbers<[1], [0], [0], [1], [0, 0, 1, 1], [], []>} : vector<2x32xf32>, vector<32x96xf32>, vector<2x96xf32> -> vector<2x96xf32>
    %130 = vector.broadcast %4 : vector<1x96xf32> to vector<2x96xf32>
    %131 = arith.addf %129, %130 : vector<2x96xf32>
    %132 = vector.extract_strided_slice %128 {offsets = [0, 0], sizes = [2, 64], strides = [1, 1]} : vector<2x96xf32> to vector<2x64xf32>
    %133 = vector.extract_strided_slice %131 {offsets = [0, 0], sizes = [2, 64], strides = [1, 1]} : vector<2x96xf32> to vector<2x64xf32>
    %134 = arith.addf %132, %133 : vector<2x64xf32>
    %cst_37 = arith.constant 5.000000e-01 : f32
    %135 = vector.broadcast %cst_37 : f32 to vector<2x64xf32>
    %136 = arith.mulf %135, %134 : vector<2x64xf32>
    %137 = math.tanh %136 : vector<2x64xf32>
    %cst_38 = arith.constant 5.000000e-01 : f32
    %138 = vector.broadcast %cst_38 : f32 to vector<2x64xf32>
    %139 = arith.mulf %138, %137 : vector<2x64xf32>
    %cst_39 = arith.constant 5.000000e-01 : f32
    %140 = vector.broadcast %cst_39 : f32 to vector<2x64xf32>
    %141 = arith.addf %139, %140 : vector<2x64xf32>
    %142 = vector.extract_strided_slice %141 {offsets = [0, 0], sizes = [2, 32], strides = [1, 1]} : vector<2x64xf32> to vector<2x32xf32>
    %143 = vector.extract_strided_slice %141 {offsets = [0, 32], sizes = [2, 32], strides = [1, 1]} : vector<2x64xf32> to vector<2x32xf32>
    %144 = vector.extract_strided_slice %128 {offsets = [0, 64], sizes = [2, 32], strides = [1, 1]} : vector<2x96xf32> to vector<2x32xf32>
    %145 = vector.extract_strided_slice %131 {offsets = [0, 64], sizes = [2, 32], strides = [1, 1]} : vector<2x96xf32> to vector<2x32xf32>
    %146 = arith.mulf %142, %145 : vector<2x32xf32>
    %147 = arith.addf %144, %146 : vector<2x32xf32>
    %148 = math.tanh %147 : vector<2x32xf32>
    %cst_40 = arith.constant 1.000000e+00 : f32
    %149 = vector.broadcast %cst_40 : f32 to vector<2x32xf32>
    %150 = arith.subf %149, %143 : vector<2x32xf32>
    %151 = arith.mulf %150, %148 : vector<2x32xf32>
    %152 = arith.mulf %143, %103 : vector<2x32xf32>
    %153 = arith.addf %151, %152 : vector<2x32xf32>
    %154 = tpu.concatenate %153, %127 in 1 : vector<2x32xf32>, vector<2x32xf32> -> vector<2x64xf32>
    %cst_41 = arith.constant dense<0.000000e+00> : vector<2x128xf32>
    %155 = tpu.matmul %154, %25, %cst_41 {dimension_numbers = #tpu.dot_dimension_numbers<[1], [0], [0], [1], [0, 0, 1, 1], [], []>} : vector<2x64xf32>, vector<64x128xf32>, vector<2x128xf32> -> vector<2x128xf32>
    %156 = vector.broadcast %5 : vector<1x128xf32> to vector<2x128xf32>
    %157 = arith.addf %155, %156 : vector<2x128xf32>
    %158 = vector.extract_strided_slice %157 {offsets = [0, 0], sizes = [2, 64], strides = [1, 1]} : vector<2x128xf32> to vector<2x64xf32>
    %cst_42 = arith.constant 5.000000e-01 : f32
    %159 = vector.broadcast %cst_42 : f32 to vector<2x64xf32>
    %160 = arith.mulf %159, %158 : vector<2x64xf32>
    %161 = math.tanh %160 : vector<2x64xf32>
    %cst_43 = arith.constant 5.000000e-01 : f32
    %162 = vector.broadcast %cst_43 : f32 to vector<2x64xf32>
    %163 = arith.mulf %162, %161 : vector<2x64xf32>
    %cst_44 = arith.constant 5.000000e-01 : f32
    %164 = vector.broadcast %cst_44 : f32 to vector<2x64xf32>
    %165 = arith.addf %163, %164 : vector<2x64xf32>
    %166 = vector.extract_strided_slice %165 {offsets = [0, 0], sizes = [2, 32], strides = [1, 1]} : vector<2x64xf32> to vector<2x32xf32>
    %167 = vector.extract_strided_slice %165 {offsets = [0, 32], sizes = [2, 32], strides = [1, 1]} : vector<2x64xf32> to vector<2x32xf32>
    %168 = vector.extract_strided_slice %157 {offsets = [0, 64], sizes = [2, 32], strides = [1, 1]} : vector<2x128xf32> to vector<2x32xf32>
    %169 = vector.extract_strided_slice %157 {offsets = [0, 96], sizes = [2, 32], strides = [1, 1]} : vector<2x128xf32> to vector<2x32xf32>
    %170 = arith.mulf %166, %169 : vector<2x32xf32>
    %171 = arith.addf %168, %170 : vector<2x32xf32>
    %172 = math.tanh %171 : vector<2x32xf32>
    %cst_45 = arith.constant 1.000000e+00 : f32
    %173 = vector.broadcast %cst_45 : f32 to vector<2x32xf32>
    %174 = arith.subf %173, %167 : vector<2x32xf32>
    %175 = arith.mulf %174, %172 : vector<2x32xf32>
    %176 = arith.mulf %167, %127 : vector<2x32xf32>
    %177 = arith.addf %175, %176 : vector<2x32xf32>
    %178 = vector.extract_strided_slice %23 {offsets = [6, 0], sizes = [2, 96], strides = [1, 1]} : vector<16x96xf32> to vector<2x96xf32>
    %cst_46 = arith.constant dense<0.000000e+00> : vector<2x96xf32>
    %179 = tpu.matmul %153, %24, %cst_46 {dimension_numbers = #tpu.dot_dimension_numbers<[1], [0], [0], [1], [0, 0, 1, 1], [], []>} : vector<2x32xf32>, vector<32x96xf32>, vector<2x96xf32> -> vector<2x96xf32>
    %180 = vector.broadcast %4 : vector<1x96xf32> to vector<2x96xf32>
    %181 = arith.addf %179, %180 : vector<2x96xf32>
    %182 = vector.extract_strided_slice %178 {offsets = [0, 0], sizes = [2, 64], strides = [1, 1]} : vector<2x96xf32> to vector<2x64xf32>
    %183 = vector.extract_strided_slice %181 {offsets = [0, 0], sizes = [2, 64], strides = [1, 1]} : vector<2x96xf32> to vector<2x64xf32>
    %184 = arith.addf %182, %183 : vector<2x64xf32>
    %cst_47 = arith.constant 5.000000e-01 : f32
    %185 = vector.broadcast %cst_47 : f32 to vector<2x64xf32>
    %186 = arith.mulf %185, %184 : vector<2x64xf32>
    %187 = math.tanh %186 : vector<2x64xf32>
    %cst_48 = arith.constant 5.000000e-01 : f32
    %188 = vector.broadcast %cst_48 : f32 to vector<2x64xf32>
    %189 = arith.mulf %188, %187 : vector<2x64xf32>
    %cst_49 = arith.constant 5.000000e-01 : f32
    %190 = vector.broadcast %cst_49 : f32 to vector<2x64xf32>
    %191 = arith.addf %189, %190 : vector<2x64xf32>
    %192 = vector.extract_strided_slice %191 {offsets = [0, 0], sizes = [2, 32], strides = [1, 1]} : vector<2x64xf32> to vector<2x32xf32>
    %193 = vector.extract_strided_slice %191 {offsets = [0, 32], sizes = [2, 32], strides = [1, 1]} : vector<2x64xf32> to vector<2x32xf32>
    %194 = vector.extract_strided_slice %178 {offsets = [0, 64], sizes = [2, 32], strides = [1, 1]} : vector<2x96xf32> to vector<2x32xf32>
    %195 = vector.extract_strided_slice %181 {offsets = [0, 64], sizes = [2, 32], strides = [1, 1]} : vector<2x96xf32> to vector<2x32xf32>
    %196 = arith.mulf %192, %195 : vector<2x32xf32>
    %197 = arith.addf %194, %196 : vector<2x32xf32>
    %198 = math.tanh %197 : vector<2x32xf32>
    %cst_50 = arith.constant 1.000000e+00 : f32
    %199 = vector.broadcast %cst_50 : f32 to vector<2x32xf32>
    %200 = arith.subf %199, %193 : vector<2x32xf32>
    %201 = arith.mulf %200, %198 : vector<2x32xf32>
    %202 = arith.mulf %193, %153 : vector<2x32xf32>
    %203 = arith.addf %201, %202 : vector<2x32xf32>
    %204 = tpu.concatenate %203, %177 in 1 : vector<2x32xf32>, vector<2x32xf32> -> vector<2x64xf32>
    %cst_51 = arith.constant dense<0.000000e+00> : vector<2x128xf32>
    %205 = tpu.matmul %204, %25, %cst_51 {dimension_numbers = #tpu.dot_dimension_numbers<[1], [0], [0], [1], [0, 0, 1, 1], [], []>} : vector<2x64xf32>, vector<64x128xf32>, vector<2x128xf32> -> vector<2x128xf32>
    %206 = vector.broadcast %5 : vector<1x128xf32> to vector<2x128xf32>
    %207 = arith.addf %205, %206 : vector<2x128xf32>
    %208 = vector.extract_strided_slice %207 {offsets = [0, 0], sizes = [2, 64], strides = [1, 1]} : vector<2x128xf32> to vector<2x64xf32>
    %cst_52 = arith.constant 5.000000e-01 : f32
    %209 = vector.broadcast %cst_52 : f32 to vector<2x64xf32>
    %210 = arith.mulf %209, %208 : vector<2x64xf32>
    %211 = math.tanh %210 : vector<2x64xf32>
    %cst_53 = arith.constant 5.000000e-01 : f32
    %212 = vector.broadcast %cst_53 : f32 to vector<2x64xf32>
    %213 = arith.mulf %212, %211 : vector<2x64xf32>
    %cst_54 = arith.constant 5.000000e-01 : f32
    %214 = vector.broadcast %cst_54 : f32 to vector<2x64xf32>
    %215 = arith.addf %213, %214 : vector<2x64xf32>
    %216 = vector.extract_strided_slice %215 {offsets = [0, 0], sizes = [2, 32], strides = [1, 1]} : vector<2x64xf32> to vector<2x32xf32>
    %217 = vector.extract_strided_slice %215 {offsets = [0, 32], sizes = [2, 32], strides = [1, 1]} : vector<2x64xf32> to vector<2x32xf32>
    %218 = vector.extract_strided_slice %207 {offsets = [0, 64], sizes = [2, 32], strides = [1, 1]} : vector<2x128xf32> to vector<2x32xf32>
    %219 = vector.extract_strided_slice %207 {offsets = [0, 96], sizes = [2, 32], strides = [1, 1]} : vector<2x128xf32> to vector<2x32xf32>
    %220 = arith.mulf %216, %219 : vector<2x32xf32>
    %221 = arith.addf %218, %220 : vector<2x32xf32>
    %222 = math.tanh %221 : vector<2x32xf32>
    %cst_55 = arith.constant 1.000000e+00 : f32
    %223 = vector.broadcast %cst_55 : f32 to vector<2x32xf32>
    %224 = arith.subf %223, %217 : vector<2x32xf32>
    %225 = arith.mulf %224, %222 : vector<2x32xf32>
    %226 = arith.mulf %217, %177 : vector<2x32xf32>
    %227 = arith.addf %225, %226 : vector<2x32xf32>
    %228 = vector.extract_strided_slice %23 {offsets = [8, 0], sizes = [2, 96], strides = [1, 1]} : vector<16x96xf32> to vector<2x96xf32>
    %cst_56 = arith.constant dense<0.000000e+00> : vector<2x96xf32>
    %229 = tpu.matmul %203, %24, %cst_56 {dimension_numbers = #tpu.dot_dimension_numbers<[1], [0], [0], [1], [0, 0, 1, 1], [], []>} : vector<2x32xf32>, vector<32x96xf32>, vector<2x96xf32> -> vector<2x96xf32>
    %230 = vector.broadcast %4 : vector<1x96xf32> to vector<2x96xf32>
    %231 = arith.addf %229, %230 : vector<2x96xf32>
    %232 = vector.extract_strided_slice %228 {offsets = [0, 0], sizes = [2, 64], strides = [1, 1]} : vector<2x96xf32> to vector<2x64xf32>
    %233 = vector.extract_strided_slice %231 {offsets = [0, 0], sizes = [2, 64], strides = [1, 1]} : vector<2x96xf32> to vector<2x64xf32>
    %234 = arith.addf %232, %233 : vector<2x64xf32>
    %cst_57 = arith.constant 5.000000e-01 : f32
    %235 = vector.broadcast %cst_57 : f32 to vector<2x64xf32>
    %236 = arith.mulf %235, %234 : vector<2x64xf32>
    %237 = math.tanh %236 : vector<2x64xf32>
    %cst_58 = arith.constant 5.000000e-01 : f32
    %238 = vector.broadcast %cst_58 : f32 to vector<2x64xf32>
    %239 = arith.mulf %238, %237 : vector<2x64xf32>
    %cst_59 = arith.constant 5.000000e-01 : f32
    %240 = vector.broadcast %cst_59 : f32 to vector<2x64xf32>
    %241 = arith.addf %239, %240 : vector<2x64xf32>
    %242 = vector.extract_strided_slice %241 {offsets = [0, 0], sizes = [2, 32], strides = [1, 1]} : vector<2x64xf32> to vector<2x32xf32>
    %243 = vector.extract_strided_slice %241 {offsets = [0, 32], sizes = [2, 32], strides = [1, 1]} : vector<2x64xf32> to vector<2x32xf32>
    %244 = vector.extract_strided_slice %228 {offsets = [0, 64], sizes = [2, 32], strides = [1, 1]} : vector<2x96xf32> to vector<2x32xf32>
    %245 = vector.extract_strided_slice %231 {offsets = [0, 64], sizes = [2, 32], strides = [1, 1]} : vector<2x96xf32> to vector<2x32xf32>
    %246 = arith.mulf %242, %245 : vector<2x32xf32>
    %247 = arith.addf %244, %246 : vector<2x32xf32>
    %248 = math.tanh %247 : vector<2x32xf32>
    %cst_60 = arith.constant 1.000000e+00 : f32
    %249 = vector.broadcast %cst_60 : f32 to vector<2x32xf32>
    %250 = arith.subf %249, %243 : vector<2x32xf32>
    %251 = arith.mulf %250, %248 : vector<2x32xf32>
    %252 = arith.mulf %243, %203 : vector<2x32xf32>
    %253 = arith.addf %251, %252 : vector<2x32xf32>
    %254 = tpu.concatenate %253, %227 in 1 : vector<2x32xf32>, vector<2x32xf32> -> vector<2x64xf32>
    %cst_61 = arith.constant dense<0.000000e+00> : vector<2x128xf32>
    %255 = tpu.matmul %254, %25, %cst_61 {dimension_numbers = #tpu.dot_dimension_numbers<[1], [0], [0], [1], [0, 0, 1, 1], [], []>} : vector<2x64xf32>, vector<64x128xf32>, vector<2x128xf32> -> vector<2x128xf32>
    %256 = vector.broadcast %5 : vector<1x128xf32> to vector<2x128xf32>
    %257 = arith.addf %255, %256 : vector<2x128xf32>
    %258 = vector.extract_strided_slice %257 {offsets = [0, 0], sizes = [2, 64], strides = [1, 1]} : vector<2x128xf32> to vector<2x64xf32>
    %cst_62 = arith.constant 5.000000e-01 : f32
    %259 = vector.broadcast %cst_62 : f32 to vector<2x64xf32>
    %260 = arith.mulf %259, %258 : vector<2x64xf32>
    %261 = math.tanh %260 : vector<2x64xf32>
    %cst_63 = arith.constant 5.000000e-01 : f32
    %262 = vector.broadcast %cst_63 : f32 to vector<2x64xf32>
    %263 = arith.mulf %262, %261 : vector<2x64xf32>
    %cst_64 = arith.constant 5.000000e-01 : f32
    %264 = vector.broadcast %cst_64 : f32 to vector<2x64xf32>
    %265 = arith.addf %263, %264 : vector<2x64xf32>
    %266 = vector.extract_strided_slice %265 {offsets = [0, 0], sizes = [2, 32], strides = [1, 1]} : vector<2x64xf32> to vector<2x32xf32>
    %267 = vector.extract_strided_slice %265 {offsets = [0, 32], sizes = [2, 32], strides = [1, 1]} : vector<2x64xf32> to vector<2x32xf32>
    %268 = vector.extract_strided_slice %257 {offsets = [0, 64], sizes = [2, 32], strides = [1, 1]} : vector<2x128xf32> to vector<2x32xf32>
    %269 = vector.extract_strided_slice %257 {offsets = [0, 96], sizes = [2, 32], strides = [1, 1]} : vector<2x128xf32> to vector<2x32xf32>
    %270 = arith.mulf %266, %269 : vector<2x32xf32>
    %271 = arith.addf %268, %270 : vector<2x32xf32>
    %272 = math.tanh %271 : vector<2x32xf32>
    %cst_65 = arith.constant 1.000000e+00 : f32
    %273 = vector.broadcast %cst_65 : f32 to vector<2x32xf32>
    %274 = arith.subf %273, %267 : vector<2x32xf32>
    %275 = arith.mulf %274, %272 : vector<2x32xf32>
    %276 = arith.mulf %267, %227 : vector<2x32xf32>
    %277 = arith.addf %275, %276 : vector<2x32xf32>
    %278 = vector.extract_strided_slice %23 {offsets = [10, 0], sizes = [2, 96], strides = [1, 1]} : vector<16x96xf32> to vector<2x96xf32>
    %cst_66 = arith.constant dense<0.000000e+00> : vector<2x96xf32>
    %279 = tpu.matmul %253, %24, %cst_66 {dimension_numbers = #tpu.dot_dimension_numbers<[1], [0], [0], [1], [0, 0, 1, 1], [], []>} : vector<2x32xf32>, vector<32x96xf32>, vector<2x96xf32> -> vector<2x96xf32>
    %280 = vector.broadcast %4 : vector<1x96xf32> to vector<2x96xf32>
    %281 = arith.addf %279, %280 : vector<2x96xf32>
    %282 = vector.extract_strided_slice %278 {offsets = [0, 0], sizes = [2, 64], strides = [1, 1]} : vector<2x96xf32> to vector<2x64xf32>
    %283 = vector.extract_strided_slice %281 {offsets = [0, 0], sizes = [2, 64], strides = [1, 1]} : vector<2x96xf32> to vector<2x64xf32>
    %284 = arith.addf %282, %283 : vector<2x64xf32>
    %cst_67 = arith.constant 5.000000e-01 : f32
    %285 = vector.broadcast %cst_67 : f32 to vector<2x64xf32>
    %286 = arith.mulf %285, %284 : vector<2x64xf32>
    %287 = math.tanh %286 : vector<2x64xf32>
    %cst_68 = arith.constant 5.000000e-01 : f32
    %288 = vector.broadcast %cst_68 : f32 to vector<2x64xf32>
    %289 = arith.mulf %288, %287 : vector<2x64xf32>
    %cst_69 = arith.constant 5.000000e-01 : f32
    %290 = vector.broadcast %cst_69 : f32 to vector<2x64xf32>
    %291 = arith.addf %289, %290 : vector<2x64xf32>
    %292 = vector.extract_strided_slice %291 {offsets = [0, 0], sizes = [2, 32], strides = [1, 1]} : vector<2x64xf32> to vector<2x32xf32>
    %293 = vector.extract_strided_slice %291 {offsets = [0, 32], sizes = [2, 32], strides = [1, 1]} : vector<2x64xf32> to vector<2x32xf32>
    %294 = vector.extract_strided_slice %278 {offsets = [0, 64], sizes = [2, 32], strides = [1, 1]} : vector<2x96xf32> to vector<2x32xf32>
    %295 = vector.extract_strided_slice %281 {offsets = [0, 64], sizes = [2, 32], strides = [1, 1]} : vector<2x96xf32> to vector<2x32xf32>
    %296 = arith.mulf %292, %295 : vector<2x32xf32>
    %297 = arith.addf %294, %296 : vector<2x32xf32>
    %298 = math.tanh %297 : vector<2x32xf32>
    %cst_70 = arith.constant 1.000000e+00 : f32
    %299 = vector.broadcast %cst_70 : f32 to vector<2x32xf32>
    %300 = arith.subf %299, %293 : vector<2x32xf32>
    %301 = arith.mulf %300, %298 : vector<2x32xf32>
    %302 = arith.mulf %293, %253 : vector<2x32xf32>
    %303 = arith.addf %301, %302 : vector<2x32xf32>
    %304 = tpu.concatenate %303, %277 in 1 : vector<2x32xf32>, vector<2x32xf32> -> vector<2x64xf32>
    %cst_71 = arith.constant dense<0.000000e+00> : vector<2x128xf32>
    %305 = tpu.matmul %304, %25, %cst_71 {dimension_numbers = #tpu.dot_dimension_numbers<[1], [0], [0], [1], [0, 0, 1, 1], [], []>} : vector<2x64xf32>, vector<64x128xf32>, vector<2x128xf32> -> vector<2x128xf32>
    %306 = vector.broadcast %5 : vector<1x128xf32> to vector<2x128xf32>
    %307 = arith.addf %305, %306 : vector<2x128xf32>
    %308 = vector.extract_strided_slice %307 {offsets = [0, 0], sizes = [2, 64], strides = [1, 1]} : vector<2x128xf32> to vector<2x64xf32>
    %cst_72 = arith.constant 5.000000e-01 : f32
    %309 = vector.broadcast %cst_72 : f32 to vector<2x64xf32>
    %310 = arith.mulf %309, %308 : vector<2x64xf32>
    %311 = math.tanh %310 : vector<2x64xf32>
    %cst_73 = arith.constant 5.000000e-01 : f32
    %312 = vector.broadcast %cst_73 : f32 to vector<2x64xf32>
    %313 = arith.mulf %312, %311 : vector<2x64xf32>
    %cst_74 = arith.constant 5.000000e-01 : f32
    %314 = vector.broadcast %cst_74 : f32 to vector<2x64xf32>
    %315 = arith.addf %313, %314 : vector<2x64xf32>
    %316 = vector.extract_strided_slice %315 {offsets = [0, 0], sizes = [2, 32], strides = [1, 1]} : vector<2x64xf32> to vector<2x32xf32>
    %317 = vector.extract_strided_slice %315 {offsets = [0, 32], sizes = [2, 32], strides = [1, 1]} : vector<2x64xf32> to vector<2x32xf32>
    %318 = vector.extract_strided_slice %307 {offsets = [0, 64], sizes = [2, 32], strides = [1, 1]} : vector<2x128xf32> to vector<2x32xf32>
    %319 = vector.extract_strided_slice %307 {offsets = [0, 96], sizes = [2, 32], strides = [1, 1]} : vector<2x128xf32> to vector<2x32xf32>
    %320 = arith.mulf %316, %319 : vector<2x32xf32>
    %321 = arith.addf %318, %320 : vector<2x32xf32>
    %322 = math.tanh %321 : vector<2x32xf32>
    %cst_75 = arith.constant 1.000000e+00 : f32
    %323 = vector.broadcast %cst_75 : f32 to vector<2x32xf32>
    %324 = arith.subf %323, %317 : vector<2x32xf32>
    %325 = arith.mulf %324, %322 : vector<2x32xf32>
    %326 = arith.mulf %317, %277 : vector<2x32xf32>
    %327 = arith.addf %325, %326 : vector<2x32xf32>
    %328 = vector.extract_strided_slice %23 {offsets = [12, 0], sizes = [2, 96], strides = [1, 1]} : vector<16x96xf32> to vector<2x96xf32>
    %cst_76 = arith.constant dense<0.000000e+00> : vector<2x96xf32>
    %329 = tpu.matmul %303, %24, %cst_76 {dimension_numbers = #tpu.dot_dimension_numbers<[1], [0], [0], [1], [0, 0, 1, 1], [], []>} : vector<2x32xf32>, vector<32x96xf32>, vector<2x96xf32> -> vector<2x96xf32>
    %330 = vector.broadcast %4 : vector<1x96xf32> to vector<2x96xf32>
    %331 = arith.addf %329, %330 : vector<2x96xf32>
    %332 = vector.extract_strided_slice %328 {offsets = [0, 0], sizes = [2, 64], strides = [1, 1]} : vector<2x96xf32> to vector<2x64xf32>
    %333 = vector.extract_strided_slice %331 {offsets = [0, 0], sizes = [2, 64], strides = [1, 1]} : vector<2x96xf32> to vector<2x64xf32>
    %334 = arith.addf %332, %333 : vector<2x64xf32>
    %cst_77 = arith.constant 5.000000e-01 : f32
    %335 = vector.broadcast %cst_77 : f32 to vector<2x64xf32>
    %336 = arith.mulf %335, %334 : vector<2x64xf32>
    %337 = math.tanh %336 : vector<2x64xf32>
    %cst_78 = arith.constant 5.000000e-01 : f32
    %338 = vector.broadcast %cst_78 : f32 to vector<2x64xf32>
    %339 = arith.mulf %338, %337 : vector<2x64xf32>
    %cst_79 = arith.constant 5.000000e-01 : f32
    %340 = vector.broadcast %cst_79 : f32 to vector<2x64xf32>
    %341 = arith.addf %339, %340 : vector<2x64xf32>
    %342 = vector.extract_strided_slice %341 {offsets = [0, 0], sizes = [2, 32], strides = [1, 1]} : vector<2x64xf32> to vector<2x32xf32>
    %343 = vector.extract_strided_slice %341 {offsets = [0, 32], sizes = [2, 32], strides = [1, 1]} : vector<2x64xf32> to vector<2x32xf32>
    %344 = vector.extract_strided_slice %328 {offsets = [0, 64], sizes = [2, 32], strides = [1, 1]} : vector<2x96xf32> to vector<2x32xf32>
    %345 = vector.extract_strided_slice %331 {offsets = [0, 64], sizes = [2, 32], strides = [1, 1]} : vector<2x96xf32> to vector<2x32xf32>
    %346 = arith.mulf %342, %345 : vector<2x32xf32>
    %347 = arith.addf %344, %346 : vector<2x32xf32>
    %348 = math.tanh %347 : vector<2x32xf32>
    %cst_80 = arith.constant 1.000000e+00 : f32
    %349 = vector.broadcast %cst_80 : f32 to vector<2x32xf32>
    %350 = arith.subf %349, %343 : vector<2x32xf32>
    %351 = arith.mulf %350, %348 : vector<2x32xf32>
    %352 = arith.mulf %343, %303 : vector<2x32xf32>
    %353 = arith.addf %351, %352 : vector<2x32xf32>
    %354 = tpu.concatenate %353, %327 in 1 : vector<2x32xf32>, vector<2x32xf32> -> vector<2x64xf32>
    %cst_81 = arith.constant dense<0.000000e+00> : vector<2x128xf32>
    %355 = tpu.matmul %354, %25, %cst_81 {dimension_numbers = #tpu.dot_dimension_numbers<[1], [0], [0], [1], [0, 0, 1, 1], [], []>} : vector<2x64xf32>, vector<64x128xf32>, vector<2x128xf32> -> vector<2x128xf32>
    %356 = vector.broadcast %5 : vector<1x128xf32> to vector<2x128xf32>
    %357 = arith.addf %355, %356 : vector<2x128xf32>
    %358 = vector.extract_strided_slice %357 {offsets = [0, 0], sizes = [2, 64], strides = [1, 1]} : vector<2x128xf32> to vector<2x64xf32>
    %cst_82 = arith.constant 5.000000e-01 : f32
    %359 = vector.broadcast %cst_82 : f32 to vector<2x64xf32>
    %360 = arith.mulf %359, %358 : vector<2x64xf32>
    %361 = math.tanh %360 : vector<2x64xf32>
    %cst_83 = arith.constant 5.000000e-01 : f32
    %362 = vector.broadcast %cst_83 : f32 to vector<2x64xf32>
    %363 = arith.mulf %362, %361 : vector<2x64xf32>
    %cst_84 = arith.constant 5.000000e-01 : f32
    %364 = vector.broadcast %cst_84 : f32 to vector<2x64xf32>
    %365 = arith.addf %363, %364 : vector<2x64xf32>
    %366 = vector.extract_strided_slice %365 {offsets = [0, 0], sizes = [2, 32], strides = [1, 1]} : vector<2x64xf32> to vector<2x32xf32>
    %367 = vector.extract_strided_slice %365 {offsets = [0, 32], sizes = [2, 32], strides = [1, 1]} : vector<2x64xf32> to vector<2x32xf32>
    %368 = vector.extract_strided_slice %357 {offsets = [0, 64], sizes = [2, 32], strides = [1, 1]} : vector<2x128xf32> to vector<2x32xf32>
    %369 = vector.extract_strided_slice %357 {offsets = [0, 96], sizes = [2, 32], strides = [1, 1]} : vector<2x128xf32> to vector<2x32xf32>
    %370 = arith.mulf %366, %369 : vector<2x32xf32>
    %371 = arith.addf %368, %370 : vector<2x32xf32>
    %372 = math.tanh %371 : vector<2x32xf32>
    %cst_85 = arith.constant 1.000000e+00 : f32
    %373 = vector.broadcast %cst_85 : f32 to vector<2x32xf32>
    %374 = arith.subf %373, %367 : vector<2x32xf32>
    %375 = arith.mulf %374, %372 : vector<2x32xf32>
    %376 = arith.mulf %367, %327 : vector<2x32xf32>
    %377 = arith.addf %375, %376 : vector<2x32xf32>
    %378 = vector.extract_strided_slice %23 {offsets = [14, 0], sizes = [2, 96], strides = [1, 1]} : vector<16x96xf32> to vector<2x96xf32>
    %cst_86 = arith.constant dense<0.000000e+00> : vector<2x96xf32>
    %379 = tpu.matmul %353, %24, %cst_86 {dimension_numbers = #tpu.dot_dimension_numbers<[1], [0], [0], [1], [0, 0, 1, 1], [], []>} : vector<2x32xf32>, vector<32x96xf32>, vector<2x96xf32> -> vector<2x96xf32>
    %380 = vector.broadcast %4 : vector<1x96xf32> to vector<2x96xf32>
    %381 = arith.addf %379, %380 : vector<2x96xf32>
    %382 = vector.extract_strided_slice %378 {offsets = [0, 0], sizes = [2, 64], strides = [1, 1]} : vector<2x96xf32> to vector<2x64xf32>
    %383 = vector.extract_strided_slice %381 {offsets = [0, 0], sizes = [2, 64], strides = [1, 1]} : vector<2x96xf32> to vector<2x64xf32>
    %384 = arith.addf %382, %383 : vector<2x64xf32>
    %cst_87 = arith.constant 5.000000e-01 : f32
    %385 = vector.broadcast %cst_87 : f32 to vector<2x64xf32>
    %386 = arith.mulf %385, %384 : vector<2x64xf32>
    %387 = math.tanh %386 : vector<2x64xf32>
    %cst_88 = arith.constant 5.000000e-01 : f32
    %388 = vector.broadcast %cst_88 : f32 to vector<2x64xf32>
    %389 = arith.mulf %388, %387 : vector<2x64xf32>
    %cst_89 = arith.constant 5.000000e-01 : f32
    %390 = vector.broadcast %cst_89 : f32 to vector<2x64xf32>
    %391 = arith.addf %389, %390 : vector<2x64xf32>
    %392 = vector.extract_strided_slice %391 {offsets = [0, 0], sizes = [2, 32], strides = [1, 1]} : vector<2x64xf32> to vector<2x32xf32>
    %393 = vector.extract_strided_slice %391 {offsets = [0, 32], sizes = [2, 32], strides = [1, 1]} : vector<2x64xf32> to vector<2x32xf32>
    %394 = vector.extract_strided_slice %378 {offsets = [0, 64], sizes = [2, 32], strides = [1, 1]} : vector<2x96xf32> to vector<2x32xf32>
    %395 = vector.extract_strided_slice %381 {offsets = [0, 64], sizes = [2, 32], strides = [1, 1]} : vector<2x96xf32> to vector<2x32xf32>
    %396 = arith.mulf %392, %395 : vector<2x32xf32>
    %397 = arith.addf %394, %396 : vector<2x32xf32>
    %398 = math.tanh %397 : vector<2x32xf32>
    %cst_90 = arith.constant 1.000000e+00 : f32
    %399 = vector.broadcast %cst_90 : f32 to vector<2x32xf32>
    %400 = arith.subf %399, %393 : vector<2x32xf32>
    %401 = arith.mulf %400, %398 : vector<2x32xf32>
    %402 = arith.mulf %393, %353 : vector<2x32xf32>
    %403 = arith.addf %401, %402 : vector<2x32xf32>
    %404 = tpu.concatenate %403, %377 in 1 : vector<2x32xf32>, vector<2x32xf32> -> vector<2x64xf32>
    %cst_91 = arith.constant dense<0.000000e+00> : vector<2x128xf32>
    %405 = tpu.matmul %404, %25, %cst_91 {dimension_numbers = #tpu.dot_dimension_numbers<[1], [0], [0], [1], [0, 0, 1, 1], [], []>} : vector<2x64xf32>, vector<64x128xf32>, vector<2x128xf32> -> vector<2x128xf32>
    %406 = vector.broadcast %5 : vector<1x128xf32> to vector<2x128xf32>
    %407 = arith.addf %405, %406 : vector<2x128xf32>
    %408 = vector.extract_strided_slice %407 {offsets = [0, 0], sizes = [2, 64], strides = [1, 1]} : vector<2x128xf32> to vector<2x64xf32>
    %cst_92 = arith.constant 5.000000e-01 : f32
    %409 = vector.broadcast %cst_92 : f32 to vector<2x64xf32>
    %410 = arith.mulf %409, %408 : vector<2x64xf32>
    %411 = math.tanh %410 : vector<2x64xf32>
    %cst_93 = arith.constant 5.000000e-01 : f32
    %412 = vector.broadcast %cst_93 : f32 to vector<2x64xf32>
    %413 = arith.mulf %412, %411 : vector<2x64xf32>
    %cst_94 = arith.constant 5.000000e-01 : f32
    %414 = vector.broadcast %cst_94 : f32 to vector<2x64xf32>
    %415 = arith.addf %413, %414 : vector<2x64xf32>
    %416 = vector.extract_strided_slice %415 {offsets = [0, 0], sizes = [2, 32], strides = [1, 1]} : vector<2x64xf32> to vector<2x32xf32>
    %417 = vector.extract_strided_slice %415 {offsets = [0, 32], sizes = [2, 32], strides = [1, 1]} : vector<2x64xf32> to vector<2x32xf32>
    %418 = vector.extract_strided_slice %407 {offsets = [0, 64], sizes = [2, 32], strides = [1, 1]} : vector<2x128xf32> to vector<2x32xf32>
    %419 = vector.extract_strided_slice %407 {offsets = [0, 96], sizes = [2, 32], strides = [1, 1]} : vector<2x128xf32> to vector<2x32xf32>
    %420 = arith.mulf %416, %419 : vector<2x32xf32>
    %421 = arith.addf %418, %420 : vector<2x32xf32>
    %422 = math.tanh %421 : vector<2x32xf32>
    %cst_95 = arith.constant 1.000000e+00 : f32
    %423 = vector.broadcast %cst_95 : f32 to vector<2x32xf32>
    %424 = arith.subf %423, %417 : vector<2x32xf32>
    %425 = arith.mulf %424, %422 : vector<2x32xf32>
    %426 = arith.mulf %417, %377 : vector<2x32xf32>
    %427 = arith.addf %425, %426 : vector<2x32xf32>
    %c152 = arith.constant 152 : index
    %c0_96 = arith.constant 0 : index
    %428 = vector.load %arg2[%c152, %c0_96] : memref<248x128xf32, #tpu.memory_space<vmem>>, vector<32x32xf32>
    %cst_97 = arith.constant dense<0.000000e+00> : vector<2x32xf32>
    %429 = tpu.matmul %18, %428, %cst_97 {dimension_numbers = #tpu.dot_dimension_numbers<[1], [0], [0], [1], [0, 0, 1, 1], [], []>} : vector<2x32xf32>, vector<32x32xf32>, vector<2x32xf32> -> vector<2x32xf32>
    %c184 = arith.constant 184 : index
    %c0_98 = arith.constant 0 : index
    %430 = vector.load %arg2[%c184, %c0_98] : memref<248x128xf32, #tpu.memory_space<vmem>>, vector<32x32xf32>
    %cst_99 = arith.constant dense<0.000000e+00> : vector<2x32xf32>
    %431 = tpu.matmul %427, %430, %cst_99 {dimension_numbers = #tpu.dot_dimension_numbers<[1], [0], [0], [1], [0, 0, 1, 1], [], []>} : vector<2x32xf32>, vector<32x32xf32>, vector<2x32xf32> -> vector<2x32xf32>
    %432 = arith.addf %429, %431 : vector<2x32xf32>
    %433 = vector.broadcast %6 : vector<1x32xf32> to vector<2x32xf32>
    %434 = arith.addf %432, %433 : vector<2x32xf32>
    %cst_100 = arith.constant 0.000000e+00 : f32
    %435 = vector.broadcast %cst_100 : f32 to vector<2x32xf32>
    %436 = arith.maximumf %434, %435 : vector<2x32xf32>
    %c216 = arith.constant 216 : index
    %c0_101 = arith.constant 0 : index
    %437 = vector.load %arg2[%c216, %c0_101] : memref<248x128xf32, #tpu.memory_space<vmem>>, vector<32x128xf32>
    %cst_102 = arith.constant dense<0.000000e+00> : vector<2x128xf32>
    %438 = tpu.matmul %436, %437, %cst_102 {dimension_numbers = #tpu.dot_dimension_numbers<[1], [0], [0], [1], [0, 0, 1, 1], [], []>} : vector<2x32xf32>, vector<32x128xf32>, vector<2x128xf32> -> vector<2x128xf32>
    %439 = vector.broadcast %7 : vector<1x128xf32> to vector<2x128xf32>
    %440 = arith.addf %438, %439 : vector<2x128xf32>
    %c0_103 = arith.constant 0 : index
    %c0_104 = arith.constant 0 : index
    %441 = vector.load %arg4[%c0_103, %c0_104] : memref<2x128xf32, #tpu.memory_space<vmem>>, vector<2x128xf32>
    tpu.vector_store %arg4[%c0_103, %c0_104], %440 {strides = array<i32>} : memref<2x128xf32, #tpu.memory_space<vmem>>, vector<2x128xf32>,
    return
  }
}

</mosaic_0001>

<bundles_post_ra>
// kernel: dynamics_gru_forward.1
= control target key start
LH: loop header
LB: loop body
LE: loop exit
PB: predicated region body
PF: predicated region fallthrough
CT: control target
= control target key end

     0   :  { %9 = vsyncpa [#allocation3], 0  ;;  %s2921_s15 = smov [#allocation2]   ;;  %s3340_s0 = inlined_call_operand.vmem [shape: f32[2,16], index: 0, kind: input, shape index: {}]   ;;  %s3341_s1 = inlined_call_operand.vmem [shape: f32[16,8], index: 1, kind: input, shape index: {}]   ;;  %s3342_s2 = inlined_call_operand.hbm [shape: f32[248,128], index: 2, kind: input, shape index: {}]   ;;  %s3343_s3 = inlined_call_operand.vmem [shape: f32[8,128], index: 3, kind: input, shape index: {}]   ;;  %s3344_s4 = inlined_call_operand.vmem [shape: f32[2,128], index: 4, kind: output, shape index: {}]  }
   0x1   :  { %s19_s16 = sshll.u32 %s2921_s15, 4  ;;  %s2897_s19 = scalar_lea.hbm %s3342_s2, 3968  ;;  %s20_s16 = int_to_ptr.vmem [resolvable:$true] %s19_s16 }
   0x2   :  { %p2898_p0 = scmp.ne.s32.totalorder %s3342_s2, %s2897_s19  ;;  %p2901_p1 = scmp.lt.u32.totalorder %s2897_s19, %s3342_s2 }
   0x4   :  { %p2903_p2 = pnand %p2901_p1, %p2898_p0 }
   0x6   :  { %2906 = shalt.err (!%p2903_p2)
}
   0x7   :  { %s2907_s24 = scalar_lea.vmem %s20_s16, 3968  ;;  %p2912_p4 = scmp.lt.s32.totalorder %s20_s16, %s20_s16 }
   0x8   :  { %p2908_p3 = scmp.ne.s32.totalorder %s20_s16, %s2907_s24  ;;  %p2913_p5 = scmp.lt.s32.totalorder %s2907_s24, %s2907_s24 }
   0xa   :  { %p2914_p6 = por %p2913_p5, %p2912_p4 }
   0xc   :  { %p2915_p7 = pnand %p2914_p6, %p2908_p3 }
   0xe   :  { %2918 = shalt.err (!%p2915_p7)
}
   0xf   :  { %s2922_s25 = smov 128   ;;  %s2923_s26 = smov 8  }
  0x10   :  { %25 = dma.hbm_to_vmem [thread:$0]  %s3342_s2, 3968, %s20_s16, [#allocation3], %s2922_s25, %s2922_s25, %s2923_s26  }
  0x11   :  { %2919 = dma.done.wait [#allocation3], 3968  }
  0x12   :  { %2920 = vsyncadd [#allocation3], 4294963328  ;;  %v2924_v0 = vmov 0.0|0.0   ;;  %vm2925_vm0 = vmmov 0   ;;  %v2926_v1 = vmov 0.0   ;;  %vm203_vm1 = vcmask 64512  }
  0x13   :  { %2652 = vmatprep.subr.bf16.mxu1 %v2924_v0  ;;  %2360 = vmatprep.mubr.msk.f32.mxu1 %vm2925_vm0, %v2926_v1  ;;  %v198_v2 = vld [vmem:[#allocation2 + $0x30] sm:$0xff]  ;;  %v196_v3 = vld [vmem:[%s3341_s1] sm:$0xff]  ;;  %v197_v4 = vld [vmem:[%s3341_s1 + $0x8] sm:$0xff]  ;;  %v35_v11 = vlaneseq  ;;  %s2927_s7 = smov 64   ;;  %vm39_vm2 = vcmask 130048   ;;  %vm122_vm3 = vcmask 261120  }
  0x14   :  { %2374 = vmatprep.subr.mxu0 %v198_v2  ;;  %2376 = vmatprep.mubr.msk.f32.mxu0 %vm203_vm1, %v196_v3  ;;  %v285_v5 = vld [vmem:[#allocation2 + $0x38] sm:$0xff]  ;;  %v286_v6 = vld [vmem:[#allocation2 + $0x40] sm:$0xff]  ;;  %v287_v7 = vld [vmem:[#allocation2 + $0x48] sm:$0xff]  ;;  %vm407_vm4 = vcmask 523264   ;;  %s2929_s10 = smov 32  }
  0x15   :  { %2375 = vmatpush3.msra.mxu0 %v198_v2  ;;  %v2976_v8 = vpack.c.bf16 %v286_v6, %v285_v5  ;;  %v288_v9 = vld [vmem:[#allocation2 + $0x50] sm:$0xff]  ;;  %v2994_v12 = vshrl.u32 %v35_v11, 7  ;;  %v3000_v14 = vld [vmem:[%s3343_s3] sm:$0xff]  ;;  %v34_v33 = vld [vmem:[#allocation2 + $0x8] sm:$0xff] }
  0x16   :  { %2377 = vmatmul.mubr.msk.f32.vlgmr.msra.gmra.mrb[0].mxu0 %vm203_vm1, %v197_v4  ;;  %2661 = vmatprep.subr.bf16.mxu0 %v2924_v0  ;;  %v2980_v10 = vpack.c.bf16 %v288_v9, %v287_v7  ;;  %v33_v32 = vld [vmem:[#allocation2] sm:$0xff]  ;;  %v114_v38 = vld [vmem:[#allocation2 + $0x10] sm:$0xff]  ;;  %v115_v39 = vld [vmem:[#allocation2 + $0x18] sm:$0xff] }
  0x17   :  { %2663 = vmatpush3.bf16.msra.mxu0 %v2976_v8  ;;  %2387 = vmatprep.mubr.msk.f32.mxu0 %vm2925_vm0, %v2926_v1  ;;  %v201_v13 = vsub.s32 2, %v2994_v12  ;;  %v299_v18 = vsub.s32 3, %v2994_v12  ;;  %v2653_v34 = vpack.c.bf16 %v34_v33, %v33_v32  ;;  %v32_v35 = vld [vmem:[%s3340_s0] sm:$0x3]  ;;  %v2656_v41 = vpack.c.bf16 %v115_v39, %v114_v38  ;;  %v117_v42 = vld [vmem:[#allocation2 + $0x28] sm:$0xff]  ;;  %s2928_s0 = smov 96  }
  0x18   :  { %2664 = vmatprep.subr.bf16.mxu0 %v2924_v0  ;;  %v116_v40 = vld [vmem:[#allocation2 + $0x20] sm:$0xff]  ;;  %v37_v45 = vsub.s32 0, %v2994_v12  ;;  %v289_v47 = vld [vmem:[#allocation2 + $0x58] sm:$0xff]  ;;  %v291_v54 = vld [vmem:[#allocation2 + $0x68] sm:$0xff]  ;;  %v405_v32 = vsub.s32 4, %v2994_v12 }
  0x19   :  { %v202_v15 = vrot.slane %v3000_v14, %v201_v13  ;;  %v3007_v20 = vrot.slane %v3000_v14, %v299_v18  ;;  %2654 = vmatpush3.bf16.msra.mxu1 %v2653_v34  ;;  %v2659_v43 = vpack.c.bf16 %v117_v42, %v116_v40  ;;  %v290_v48 = vld [vmem:[#allocation2 + $0x60] sm:$0xff]  ;;  %v292_v55 = vld [vmem:[#allocation2 + $0x70] sm:$0xff]  ;;  %v293_v57 = vld [vmem:[#allocation2 + $0x78] sm:$0xff] }
  0x1a   :  { %2655 = vmatprep.subr.bf16.mxu1 %v2924_v0  ;;  %v38_v46 = vrot.slane %v3000_v14, %v37_v45  ;;  %v3027_v52 = vpack.c.bf16 %v290_v48, %v289_v47  ;;  %v3031_v56 = vpack.c.bf16 %v292_v55, %v291_v54  ;;  %v294_v58 = vld [vmem:[#allocation2 + $0x80] sm:$0xff]  ;;  %v295_v60 = vld [vmem:[#allocation2 + $0x88] sm:$0xff]  ;;  %v296_v61 = vld [vmem:[#allocation2 + $0x90] sm:$0xff]  ;;  %v3075_v33 = vrot.slane %v3000_v14, %v405_v32 }
  0x1b   :  { %2666 = vmatpush3.bf16.msra.mxu0 %v2980_v10  ;;  %v3037_v59 = vpack.c.bf16 %v294_v58, %v293_v57  ;;  %v3041_v62 = vpack.c.bf16 %v296_v61, %v295_v60 }
  0x1c   :  { %2679 = vmatprep.subr.bf16.mxu0 %v2924_v0  ;;  %2361 = vmatmul.mubr.msk.f32.vlgmr.msra.gmra.mrb[0].mxu1 %vm39_vm2, %v32_v35 }
  0x1d   :  { %2371 = vmatprep.mubr.msk.f32.mxu1 %vm2925_vm0, %v2926_v1  ;;  %2657 = vmatpush3.bf16.msra.mxu1 %v2656_v41 }
  0x1e   :  { %2388 = vmatmul.mubr.f32.vlgmr.msra.gmra.mrb[2].mxu0 %v2926_v1  ;;  %2658 = vmatprep.subr.bf16.mxu1 %v2924_v0 }
  0x1f   :  { %2681 = vmatpush3.bf16.msra.mxu0 %v2976_v8  ;;  %2417 = vmatprep.mubr.msk.f32.mxu0 %vm2925_vm0, %v2926_v1 }
  0x20   :  { %2682 = vmatprep.subr.bf16.mxu0 %v2924_v0 }
  0x21   :  { %2660 = vmatpush3.bf16.msra.mxu1 %v2659_v43 }
  0x22   :  { %2667 = vmatprep.subr.bf16.mxu1 %v2924_v0 }
  0x23   :  { %2684 = vmatpush3.bf16.msra.mxu0 %v2980_v10 }
  0x24   :  { %2685 = vmatprep.subr.bf16.mxu0 %v2924_v0 }
  0xe9   :  { %v2378_v16 = vpop.f32.mrb[0].mxu0 }
  0xea   :  { %v3003_v17 = vadd.f32 %v2378_v16, %v202_v15  ;;  %v276_v19 = vpop.f32.mrb[1].mxu0 }
  0xeb   :  { %v3011_v24 = vadd.f32 %v276_v19, %v202_v15 }
  0xef   :  { %v109_v49 = vpop.f32.mrb[0].mxu1 }
  0xf0   :  { %v110_v50 = vadd.f32 %v109_v49, %v38_v46  ;;  %v2362_v51 = vpop.f32.mrb[1].mxu1 }
  0xf1   :  { %v370_v21 = vpop.f32.mrb[2].mxu0 }
  0xf2   :  { %v371_v22 = vadd.f32 %v370_v21, %v3007_v20  ;;  %v2389_v23 = vpop.f32.mrb[3].mxu0  ;;  %v113_v53 = vmax.f32 %v110_v50, 0.0 }
  0xf4   :  { %380 = vrot.lane.b32.xlu0 %v371_v22, %s2927_s7  ;;  %v374_v25 = vadd.f32 %v371_v22, %v3011_v24  ;;  %2372 = vmatmul.mubr.msk.f32.vlgmr.msra.gmra.mrb[2].mxu1 %vm122_vm3, %v113_v53 }
  0xf5   :  { %2669 = vmatpush3.bf16.msra.mxu1 %v3027_v52  ;;  %2406 = vmatprep.mubr.msk.f32.mxu1 %vm2925_vm0, %v2926_v1 }
  0xf6   :  { %v375_v26 = vmul.f32 0.5, %v374_v25  ;;  %2670 = vmatprep.subr.bf16.mxu1 %v2924_v0 }
  0xf8   :  { %2832 = vtanh.f32 %v375_v26 }
  0xf9   :  { %2672 = vmatpush3.bf16.msra.mxu1 %v3031_v56 }
  0xfa   :  { %2673 = vmatprep.subr.bf16.mxu1 %v2924_v0 }
  0xfd   :  { %2675 = vmatpush3.bf16.msra.mxu1 %v3037_v59 }
  0xfe   :  { %2676 = vmatprep.subr.bf16.mxu1 %v2924_v0 }
 0x101   :  { %2678 = vmatpush3.bf16.msra.mxu1 %v3041_v62 }
 0x102   :  { %v2833_v27 = vpop.eup %2832  ;;  %2697 = vmatprep.subr.bf16.mxu1 %v2924_v0 }
 0x103   :  { %v377_v28 = vmul.f32 0.5, %v2833_v27 }
 0x105   :  { %v378_v29 = vadd.f32 0.5, %v377_v28 }
 0x107   :  { %v390_v63 = vsub.f32 1.0, %v378_v29  ;;  %v396_v3 = vmul.f32 0.0, %v378_v29 }
 0x166   :  { %v381_v30 = vpop.permute.xlu0 %380 }
 0x167   :  { %v383_v31 = vmul.f32 %v381_v30, %v378_v29 }
 0x169   :  { %385 = vrot.lane.b32.xlu0 %v383_v31, %s2927_s7 }
 0x1c7   :  { %v3066_v9 = vpop.f32.mrb[2].mxu1 }
 0x1c8   :  { %v2373_v11 = vpop.f32.mrb[3].mxu1 }
 0x1db   :  { %v386_v36 = vpop.permute.xlu0 %385 }
 0x1dc   :  { %v388_v37 = vadd.f32 %v386_v36, %v3011_v24 }
 0x1de   :  { %2834 = vtanh.f32 %v388_v37 }
 0x1e8   :  { %v2835_v44 = vpop.eup %2834 }
 0x1e9   :  { %392 = vrot.lane.b32.xlu1 %v2835_v44, %s2928_s0 }
 0x25b   :  { %v393_v2 = vpop.permute.xlu1 %392 }
 0x25c   :  { %v395_v4 = vmul.f32 %v393_v2, %v390_v63 }
 0x25e   :  { %v397_v5 = vadd.f32 %v396_v3, %v395_v4 }
 0x260   :  { %399 = vrot.lane.b32.xlu1 %v397_v5, %s2928_s0  ;;  %v600_v37 = vrot.slane %v397_v5, 6 }
 0x2d2   :  { %v400_v6 = vpop.permute.xlu1 %399 }
 0x2d3   :  { %v402_v7 = vsel %vm122_vm3, %v400_v6, 0.0  ;;  %2418 = vmatmul.mubr.msk.f32.vlgmr.msra.gmra.mrb[4].mxu0 %vm122_vm3, %v400_v6 }
 0x2d4   :  { %2407 = vmatmul.mubr.msk.f32.vlgmr.msra.gmra.mrb[4].mxu1 %vm407_vm4, %v402_v7  ;;  %2687 = vmatpush3.bf16.msra.mxu0 %v3027_v52 }
 0x2d5   :  { %2699 = vmatpush3.bf16.msra.mxu1 %v2976_v8  ;;  %2447 = vmatprep.mubr.msk.f32.mxu1 %vm2925_vm0, %v2926_v1 }
 0x2d6   :  { %2700 = vmatprep.subr.bf16.mxu1 %v2924_v0  ;;  %2688 = vmatprep.subr.bf16.mxu0 %v2924_v0 }
 0x2d7   :  { %2436 = vmatprep.mubr.msk.f32.mxu0 %vm2925_vm0, %v2926_v1 }
 0x2d8   :  { %2690 = vmatpush3.bf16.msra.mxu0 %v3031_v56 }
 0x2d9   :  { %2702 = vmatpush3.bf16.msra.mxu1 %v2980_v10  ;;  %2691 = vmatprep.subr.bf16.mxu0 %v2924_v0 }
 0x2da   :  { %2703 = vmatprep.subr.bf16.mxu1 %v2924_v0 }
 0x2dc   :  { %2693 = vmatpush3.bf16.msra.mxu0 %v3037_v59 }
 0x2dd   :  { %2694 = vmatprep.subr.bf16.mxu0 %v2924_v0 }
 0x2e0   :  { %2696 = vmatpush3.bf16.msra.mxu0 %v3041_v62 }
 0x2e1   :  { %2715 = vmatprep.subr.bf16.mxu0 %v2924_v0 }
 0x3a6   :  { %v572_v13 = vpop.f32.mrb[4].mxu0 }
 0x3a7   :  { %v573_v15 = vadd.f32 %v572_v13, %v3007_v20  ;;  %v477_v16 = vpop.f32.mrb[4].mxu1  ;;  %v2419_v18 = vpop.f32.mrb[5].mxu0 }
 0x3a8   :  { %v2408_v19 = vpop.f32.mrb[5].mxu1  ;;  %v478_v35 = vadd.f32 %v477_v16, %v3075_v33 }
 0x3a9   :  { %v577_v21 = vrot.slane %v573_v15, 6 }
 0x3aa   :  { %v481_v36 = vmul.f32 0.5, %v478_v35 }
 0x3ab   :  { %584 = vrot.lane.b32.xlu0 %v577_v21, %s2927_s7  ;;  %v579_v22 = vadd.f32 %v577_v21, %v3011_v24 }
 0x3ad   :  { %v580_v23 = vmul.f32 0.5, %v579_v22 }
 0x3af   :  { %2836 = vtanh.f32 %v580_v23 }
 0x3b9   :  { %v2837_v25 = vpop.eup %2836 }
 0x3ba   :  { %v582_v26 = vmul.f32 0.5, %v2837_v25 }
 0x3bc   :  { %v583_v27 = vadd.f32 0.5, %v582_v26 }
 0x3be   :  { %v594_v38 = vsub.f32 1.0, %v583_v27  ;;  %v602_v42 = vmul.f32 %v600_v37, %v583_v27 }
 0x41d   :  { %v585_v28 = vpop.permute.xlu0 %584 }
 0x41e   :  { %v587_v29 = vmul.f32 %v585_v28, %v583_v27 }
 0x420   :  { %589 = vrot.lane.b32.xlu1 %v587_v29, %s2927_s7 }
 0x492   :  { %v590_v30 = vpop.permute.xlu1 %589 }
 0x493   :  { %v592_v31 = vadd.f32 %v590_v30, %v3011_v24 }
 0x495   :  { %2838 = vtanh.f32 %v592_v31 }
 0x496   :  { %2840 = vtanh.f32 %v481_v36 }
 0x49f   :  { %v2839_v34 = vpop.eup %2838 }
 0x4a0   :  { %596 = vrot.lane.b32.xlu0 %v2839_v34, %s2928_s0  ;;  %v2841_v39 = vpop.eup %2840 }
 0x4a1   :  { %v483_v14 = vmul.f32 0.5, %v2841_v39 }
 0x4a3   :  { %v484_v46 = vadd.f32 0.5, %v483_v14 }
 0x4a4   :  { %486 = vrot.lane.b32.xlu0 %v478_v35, %s2929_s10 }
 0x4a5   :  { %v496_v53 = vsub.f32 1.0, %v484_v46  ;;  %v502_v55 = vmul.f32 0.0, %v484_v46 }
 0x512   :  { %v597_v40 = vpop.permute.xlu0 %596 }
 0x513   :  { %v599_v41 = vmul.f32 %v597_v40, %v594_v38 }
 0x515   :  { %v3080_v43 = vadd.f32 %v602_v42, %v599_v41 }
 0x516   :  { %v487_v45 = vpop.permute.xlu0 %486 }
 0x517   :  { %v709_v44 = vrot.slane %v3080_v43, 2  ;;  %v489_v47 = vmul.f32 %v487_v45, %v484_v46  ;;  %v808_v30 = vrot.slane %v3080_v43, 6 }
 0x519   :  { %710 = vrot.lane.b32.xlu1 %v709_v44, %s2928_s0 }
 0x51d   :  { %491 = vrot.lane.b32.xlu1 %v489_v47, %s2927_s7 }
 0x58b   :  { %v711_v48 = vpop.permute.xlu1 %710 }
 0x58c   :  { %2448 = vmatmul.mubr.msk.f32.vlgmr.msra.gmra.mrb[6].mxu1 %vm122_vm3, %v711_v48 }
 0x58d   :  { %2705 = vmatpush3.bf16.msra.mxu1 %v3027_v52  ;;  %2466 = vmatprep.mubr.msk.f32.mxu1 %vm2925_vm0, %v2926_v1 }
 0x58e   :  { %2706 = vmatprep.subr.bf16.mxu1 %v2924_v0 }
 0x58f   :  { %v492_v49 = vpop.permute.xlu1 %491 }
 0x590   :  { %v494_v50 = vadd.f32 %v492_v49, %v478_v35 }
 0x591   :  { %2708 = vmatpush3.bf16.msra.mxu1 %v3031_v56 }
 0x592   :  { %2842 = vtanh.f32 %v494_v50  ;;  %2709 = vmatprep.subr.bf16.mxu1 %v2924_v0 }
 0x595   :  { %2711 = vmatpush3.bf16.msra.mxu1 %v3037_v59 }
 0x596   :  { %2712 = vmatprep.subr.bf16.mxu1 %v2924_v0 }
 0x599   :  { %2714 = vmatpush3.bf16.msra.mxu1 %v3041_v62 }
 0x59a   :  { %2733 = vmatprep.subr.bf16.mxu1 %v2924_v0 }
 0x59c   :  { %v2843_v51 = vpop.eup %2842 }
 0x59d   :  { %498 = vrot.lane.b32.xlu1 %v2843_v51, %s2928_s0 }
 0x5a1   :  { %605 = vrot.lane.b32.xlu1 %v3080_v43, %s2928_s0 }
 0x60f   :  { %v499_v54 = vpop.permute.xlu1 %498 }
 0x610   :  { %v501_v57 = vmul.f32 %v499_v54, %v496_v53 }
 0x612   :  { %v3099_v58 = vadd.f32 %v502_v55, %v501_v57 }
 0x613   :  { %v606_v61 = vpop.permute.xlu1 %605 }
 0x614   :  { %v609_v60 = vrot.slane %v3099_v58, 6 }
 0x616   :  { %v611_v63 = vsel %vm122_vm3, %v606_v61, %v609_v60 }
 0x617   :  { %v613_v2 = vrot.slane %v611_v63, 2 }
 0x619   :  { %2437 = vmatmul.mubr.msk.f32.vlgmr.msra.gmra.mrb[6].mxu0 %vm407_vm4, %v613_v2 }
 0x61a   :  { %2717 = vmatpush3.bf16.msra.mxu0 %v2976_v8  ;;  %2477 = vmatprep.mubr.msk.f32.mxu0 %vm2925_vm0, %v2926_v1 }
 0x61b   :  { %2718 = vmatprep.subr.bf16.mxu0 %v2924_v0 }
 0x61e   :  { %2720 = vmatpush3.bf16.msra.mxu0 %v2980_v10 }
 0x61f   :  { %2721 = vmatprep.subr.bf16.mxu0 %v2924_v0 }
 0x65f   :  { %v780_v3 = vpop.f32.mrb[6].mxu1 }
 0x660   :  { %v781_v4 = vadd.f32 %v780_v3, %v3007_v20  ;;  %v2449_v5 = vpop.f32.mrb[7].mxu1 }
 0x662   :  { %v785_v6 = vrot.slane %v781_v4, 4 }
 0x664   :  { %792 = vrot.lane.b32.xlu0 %v785_v6, %s2927_s7  ;;  %v787_v7 = vadd.f32 %v785_v6, %v3011_v24 }
 0x666   :  { %v788_v11 = vmul.f32 0.5, %v787_v7 }
 0x668   :  { %2844 = vtanh.f32 %v788_v11 }
 0x672   :  { %v2845_v13 = vpop.eup %2844 }
 0x673   :  { %v790_v15 = vmul.f32 0.5, %v2845_v13 }
 0x675   :  { %v791_v16 = vadd.f32 0.5, %v790_v15 }
 0x677   :  { %v802_v29 = vsub.f32 1.0, %v791_v16  ;;  %v810_v34 = vmul.f32 %v808_v30, %v791_v16 }
 0x6d6   :  { %v793_v18 = vpop.permute.xlu0 %792 }
 0x6d7   :  { %v795_v19 = vmul.f32 %v793_v18, %v791_v16 }
 0x6d9   :  { %797 = vrot.lane.b32.xlu0 %v795_v19, %s2927_s7 }
 0x6ec   :  { %v682_v21 = vpop.f32.mrb[6].mxu0 }
 0x6ed   :  { %v2438_v22 = vpop.f32.mrb[7].mxu0  ;;  %v683_v27 = vadd.f32 %v682_v21, %v3075_v33 }
 0x6ef   :  { %v686_v28 = vmul.f32 0.5, %v683_v27 }
 0x74b   :  { %v798_v23 = vpop.permute.xlu0 %797 }
 0x74c   :  { %v800_v25 = vadd.f32 %v798_v23, %v3011_v24 }
 0x74e   :  { %2846 = vtanh.f32 %v800_v25 }
 0x74f   :  { %2848 = vtanh.f32 %v686_v28 }
 0x758   :  { %v2847_v26 = vpop.eup %2846 }
 0x759   :  { %804 = vrot.lane.b32.xlu0 %v2847_v26, %s2928_s0  ;;  %v2849_v31 = vpop.eup %2848 }
 0x75a   :  { %v688_v37 = vmul.f32 0.5, %v2849_v31 }
 0x75c   :  { %v689_v40 = vadd.f32 0.5, %v688_v37 }
 0x75d   :  { %691 = vrot.lane.b32.xlu0 %v683_v27, %s2929_s10 }
 0x75e   :  { %v701_v54 = vsub.f32 1.0, %v689_v40  ;;  %v707_v60 = vmul.f32 %v689_v40, %v3099_v58 }
 0x7cb   :  { %v805_v32 = vpop.permute.xlu0 %804 }
 0x7cc   :  { %v807_v35 = vmul.f32 %v805_v32, %v802_v29 }
 0x7ce   :  { %v3119_v36 = vadd.f32 %v810_v34, %v807_v35 }
 0x7cf   :  { %v692_v39 = vpop.permute.xlu0 %691 }
 0x7d0   :  { %v917_v38 = vrot.slane %v3119_v36, 4  ;;  %v694_v41 = vmul.f32 %v692_v39, %v689_v40  ;;  %v1016_v21 = vrot.slane %v3119_v36, 6 }
 0x7d2   :  { %918 = vrot.lane.b32.xlu1 %v917_v38, %s2928_s0 }
 0x7d6   :  { %696 = vrot.lane.b32.xlu1 %v694_v41, %s2927_s7 }
 0x844   :  { %v919_v42 = vpop.permute.xlu1 %918 }
 0x845   :  { %2478 = vmatmul.mubr.msk.f32.vlgmr.msra.gmra.mrb[8].mxu0 %vm122_vm3, %v919_v42 }
 0x846   :  { %2723 = vmatpush3.bf16.msra.mxu0 %v3027_v52  ;;  %2496 = vmatprep.mubr.msk.f32.mxu0 %vm2925_vm0, %v2926_v1 }
 0x847   :  { %2724 = vmatprep.subr.bf16.mxu0 %v2924_v0 }
 0x848   :  { %v697_v43 = vpop.permute.xlu1 %696 }
 0x849   :  { %v699_v14 = vadd.f32 %v697_v43, %v683_v27 }
 0x84a   :  { %2726 = vmatpush3.bf16.msra.mxu0 %v3031_v56 }
 0x84b   :  { %2850 = vtanh.f32 %v699_v14  ;;  %2727 = vmatprep.subr.bf16.mxu0 %v2924_v0 }
 0x84e   :  { %2729 = vmatpush3.bf16.msra.mxu0 %v3037_v59 }
 0x84f   :  { %2730 = vmatprep.subr.bf16.mxu0 %v2924_v0 }
 0x852   :  { %2732 = vmatpush3.bf16.msra.mxu0 %v3041_v62 }
 0x853   :  { %2751 = vmatprep.subr.bf16.mxu0 %v2924_v0 }
 0x855   :  { %v2851_v44 = vpop.eup %2850 }
 0x856   :  { %703 = vrot.lane.b32.xlu1 %v2851_v44, %s2928_s0 }
 0x8c8   :  { %v704_v53 = vpop.permute.xlu1 %703 }
 0x8c9   :  { %v706_v55 = vmul.f32 %v704_v53, %v701_v54 }
 0x8cb   :  { %v3142_v61 = vadd.f32 %v707_v60, %v706_v55 }
 0x8cd   :  { %v817_v4 = vrot.slane %v3142_v61, 4 }
 0x918   :  { %v988_v45 = vpop.f32.mrb[8].mxu0 }
 0x919   :  { %v989_v46 = vadd.f32 %v988_v45, %v3007_v20  ;;  %v2479_v47 = vpop.f32.mrb[9].mxu0 }
 0x91b   :  { %v993_v48 = vrot.slane %v989_v46, 2 }
 0x91d   :  { %1000 = vrot.lane.b32.xlu0 %v993_v48, %s2927_s7  ;;  %v995_v49 = vadd.f32 %v993_v48, %v3011_v24 }
 0x91f   :  { %v996_v50 = vmul.f32 0.5, %v995_v49 }
 0x921   :  { %813 = vrot.lane.b32.xlu0 %v3119_v36, %s2928_s0  ;;  %2852 = vtanh.f32 %v996_v50 }
 0x92b   :  { %v2853_v51 = vpop.eup %2852 }
 0x92c   :  { %v998_v57 = vmul.f32 0.5, %v2853_v51 }
 0x92e   :  { %v999_v63 = vadd.f32 0.5, %v998_v57 }
 0x930   :  { %v1010_v19 = vsub.f32 1.0, %v999_v63  ;;  %v1018_v23 = vmul.f32 %v1016_v21, %v999_v63 }
 0x98f   :  { %v1001_v2 = vpop.permute.xlu0 %1000 }
 0x990   :  { %v1003_v3 = vmul.f32 %v1001_v2, %v999_v63 }
 0x992   :  { %1005 = vrot.lane.b32.xlu1 %v1003_v3, %s2927_s7 }
 0x993   :  { %v814_v5 = vpop.permute.xlu0 %813 }
 0x994   :  { %v819_v6 = vsel %vm122_vm3, %v814_v5, %v817_v4 }
 0x995   :  { %v821_v7 = vrot.slane %v819_v6, 4 }
 0x997   :  { %2467 = vmatmul.mubr.msk.f32.vlgmr.msra.gmra.mrb[8].mxu1 %vm407_vm4, %v821_v7 }
 0x998   :  { %2735 = vmatpush3.bf16.msra.mxu1 %v2976_v8  ;;  %2507 = vmatprep.mubr.msk.f32.mxu1 %vm2925_vm0, %v2926_v1 }
 0x999   :  { %2736 = vmatprep.subr.bf16.mxu1 %v2924_v0 }
 0x99c   :  { %2738 = vmatpush3.bf16.msra.mxu1 %v2980_v10 }
 0x99d   :  { %2739 = vmatprep.subr.bf16.mxu1 %v2924_v0 }
 0xa04   :  { %v1006_v58 = vpop.permute.xlu1 %1005 }
 0xa05   :  { %v1008_v11 = vadd.f32 %v1006_v58, %v3011_v24 }
 0xa07   :  { %2854 = vtanh.f32 %v1008_v11 }
 0xa11   :  { %v2855_v13 = vpop.eup %2854 }
 0xa12   :  { %1012 = vrot.lane.b32.xlu0 %v2855_v13, %s2928_s0 }
 0xa6a   :  { %v890_v15 = vpop.f32.mrb[8].mxu1 }
 0xa6b   :  { %v891_v16 = vadd.f32 %v890_v15, %v3075_v33  ;;  %v2468_v18 = vpop.f32.mrb[9].mxu1 }
 0xa6d   :  { %899 = vrot.lane.b32.xlu0 %v891_v16, %s2929_s10  ;;  %v894_v27 = vmul.f32 0.5, %v891_v16 }
 0xa6f   :  { %2856 = vtanh.f32 %v894_v27 }
 0xa79   :  { %v2857_v28 = vpop.eup %2856 }
 0xa7a   :  { %v896_v29 = vmul.f32 0.5, %v2857_v28 }
 0xa7c   :  { %v897_v30 = vadd.f32 0.5, %v896_v29 }
 0xa7e   :  { %v909_v41 = vsub.f32 1.0, %v897_v30  ;;  %v915_v43 = vmul.f32 %v897_v30, %v3142_v61 }
 0xa84   :  { %v1013_v22 = vpop.permute.xlu0 %1012 }
 0xa85   :  { %v1015_v25 = vmul.f32 %v1013_v22, %v1010_v19 }
 0xa87   :  { %v3159_v26 = vadd.f32 %v1018_v23, %v1015_v25 }
 0xa89   :  { %v1125_v24 = vrot.slane %v3159_v26, 6 }
 0xa8b   :  { %1126 = vrot.lane.b32.xlu1 %v1125_v24, %s2928_s0 }
 0xadf   :  { %v900_v31 = vpop.permute.xlu0 %899 }
 0xae0   :  { %v902_v32 = vmul.f32 %v900_v31, %v897_v30 }
 0xae2   :  { %904 = vrot.lane.b32.xlu1 %v902_v32, %s2927_s7 }
 0xae6   :  { %1021 = vrot.lane.b32.xlu1 %v3159_v26, %s2928_s0 }
 0xafd   :  { %v1127_v34 = vpop.permute.xlu1 %1126 }
 0xafe   :  { %2508 = vmatmul.mubr.msk.f32.vlgmr.msra.gmra.mrb[10].mxu1 %vm122_vm3, %v1127_v34 }
 0xaff   :  { %2741 = vmatpush3.bf16.msra.mxu1 %v3027_v52  ;;  %2526 = vmatprep.mubr.msk.f32.mxu1 %vm2925_vm0, %v2926_v1 }
 0xb00   :  { %2742 = vmatprep.subr.bf16.mxu1 %v2924_v0 }
 0xb03   :  { %2744 = vmatpush3.bf16.msra.mxu1 %v3031_v56 }
 0xb04   :  { %2745 = vmatprep.subr.bf16.mxu1 %v2924_v0 }
 0xb07   :  { %2747 = vmatpush3.bf16.msra.mxu1 %v3037_v59 }
 0xb08   :  { %2748 = vmatprep.subr.bf16.mxu1 %v2924_v0 }
 0xb0b   :  { %2750 = vmatpush3.bf16.msra.mxu1 %v3041_v62 }
 0xb0c   :  { %2769 = vmatprep.subr.bf16.mxu1 %v2924_v0 }
 0xb54   :  { %v905_v35 = vpop.permute.xlu1 %904 }
 0xb55   :  { %v907_v36 = vadd.f32 %v905_v35, %v891_v16 }
 0xb57   :  { %2858 = vtanh.f32 %v907_v36 }
 0xb58   :  { %v1022_v46 = vpop.permute.xlu1 %1021 }
 0xb61   :  { %v2859_v37 = vpop.eup %2858 }
 0xb62   :  { %911 = vrot.lane.b32.xlu0 %v2859_v37, %s2928_s0 }
 0xbd1   :  { %v1196_v38 = vpop.f32.mrb[10].mxu1 }
 0xbd2   :  { %v1197_v39 = vadd.f32 %v1196_v38, %v3007_v20  ;;  %v2509_v40 = vpop.f32.mrb[11].mxu1 }
 0xbd4   :  { %v912_v42 = vpop.permute.xlu0 %911  ;;  %1206 = vrot.lane.b32.xlu0 %v1197_v39, %s2927_s7  ;;  %v1200_v49 = vadd.f32 %v1197_v39, %v3003_v17 }
 0xbd5   :  { %v914_v14 = vmul.f32 %v912_v42, %v909_v41 }
 0xbd6   :  { %v1201_v50 = vmul.f32 0.5, %v1200_v49 }
 0xbd7   :  { %v916_v44 = vadd.f32 %v915_v43, %v914_v14 }
 0xbd8   :  { %2860 = vtanh.f32 %v1201_v50 }
 0xbd9   :  { %v1025_v45 = vrot.slane %v916_v44, 2 }
 0xbdb   :  { %v1027_v47 = vsel %vm122_vm3, %v1022_v46, %v1025_v45 }
 0xbdc   :  { %v1029_v48 = vrot.slane %v1027_v47, 6 }
 0xbde   :  { %2497 = vmatmul.mubr.msk.f32.vlgmr.msra.gmra.mrb[10].mxu0 %vm407_vm4, %v1029_v48 }
 0xbdf   :  { %2753 = vmatpush3.bf16.msra.mxu0 %v2976_v8  ;;  %2537 = vmatprep.mubr.msk.f32.mxu0 %vm2925_vm0, %v2926_v1 }
 0xbe0   :  { %2754 = vmatprep.subr.bf16.mxu0 %v2924_v0 }
 0xbe2   :  { %v2861_v51 = vpop.eup %2860 }
 0xbe3   :  { %2756 = vmatpush3.bf16.msra.mxu0 %v2980_v10  ;;  %v1203_v53 = vmul.f32 0.5, %v2861_v51 }
 0xbe4   :  { %2757 = vmatprep.subr.bf16.mxu0 %v2924_v0 }
 0xbe5   :  { %v1204_v54 = vadd.f32 0.5, %v1203_v53 }
 0xbe7   :  { %v1216_v7 = vsub.f32 1.0, %v1204_v54  ;;  %v1223_v11 = vmul.f32 %v1204_v54, %v1125_v24 }
 0xc46   :  { %v1207_v55 = vpop.permute.xlu0 %1206 }
 0xc47   :  { %v1209_v57 = vmul.f32 %v1207_v55, %v1204_v54 }
 0xc49   :  { %1211 = vrot.lane.b32.xlu1 %v1209_v57, %s2927_s7 }
 0xcb1   :  { %v1098_v60 = vpop.f32.mrb[10].mxu0 }
 0xcb2   :  { %v2498_v61 = vpop.f32.mrb[11].mxu0  ;;  %v1099_v4 = vadd.f32 %v1098_v60, %v3075_v33 }
 0xcb4   :  { %v1102_v5 = vmul.f32 0.5, %v1099_v4 }
 0xcbb   :  { %v1212_v63 = vpop.permute.xlu1 %1211 }
 0xcbc   :  { %v1214_v2 = vadd.f32 %v1212_v63, %v3003_v17 }
 0xcbe   :  { %2862 = vtanh.f32 %v1214_v2 }
 0xcbf   :  { %2864 = vtanh.f32 %v1102_v5 }
 0xcc8   :  { %v2863_v3 = vpop.eup %2862 }
 0xcc9   :  { %1218 = vrot.lane.b32.xlu0 %v2863_v3, %s2928_s0  ;;  %v2865_v6 = vpop.eup %2864 }
 0xcca   :  { %v1104_v15 = vmul.f32 0.5, %v2865_v6 }
 0xccc   :  { %v1105_v19 = vadd.f32 0.5, %v1104_v15 }
 0xccd   :  { %1107 = vrot.lane.b32.xlu0 %v1099_v4, %s2929_s10 }
 0xcce   :  { %v1117_v24 = vsub.f32 1.0, %v1105_v19  ;;  %v1123_v28 = vmul.f32 %v1105_v19, %v916_v44 }
 0xd3b   :  { %v1219_v58 = vpop.permute.xlu0 %1218 }
 0xd3c   :  { %v1221_v13 = vmul.f32 %v1219_v58, %v1216_v7 }
 0xd3e   :  { %v3199_v16 = vadd.f32 %v1223_v11, %v1221_v13 }
 0xd3f   :  { %v1108_v18 = vpop.permute.xlu0 %1107 }
 0xd40   :  { %1226 = vrot.lane.b32.xlu1 %v3199_v16, %s2928_s0  ;;  %v1110_v21 = vmul.f32 %v1108_v18, %v1105_v19  ;;  %v1422_v57 = vrot.slane %v3199_v16, 6 }
 0xd44   :  { %1112 = vrot.lane.b32.xlu1 %v1110_v21, %s2927_s7 }
 0xdb2   :  { %v1227_v22 = vpop.permute.xlu1 %1226 }
 0xdb3   :  { %2538 = vmatmul.mubr.msk.f32.vlgmr.msra.gmra.mrb[12].mxu0 %vm122_vm3, %v1227_v22 }
 0xdb4   :  { %2759 = vmatpush3.bf16.msra.mxu0 %v3027_v52  ;;  %2556 = vmatprep.mubr.msk.f32.mxu0 %vm2925_vm0, %v2926_v1 }
 0xdb5   :  { %2760 = vmatprep.subr.bf16.mxu0 %v2924_v0 }
 0xdb6   :  { %v1113_v23 = vpop.permute.xlu1 %1112 }
 0xdb7   :  { %v1115_v25 = vadd.f32 %v1113_v23, %v1099_v4 }
 0xdb8   :  { %2762 = vmatpush3.bf16.msra.mxu0 %v3031_v56 }
 0xdb9   :  { %2866 = vtanh.f32 %v1115_v25  ;;  %2763 = vmatprep.subr.bf16.mxu0 %v2924_v0 }
 0xdbc   :  { %2765 = vmatpush3.bf16.msra.mxu0 %v3037_v59 }
 0xdbd   :  { %2766 = vmatprep.subr.bf16.mxu0 %v2924_v0 }
 0xdc0   :  { %2768 = vmatpush3.bf16.msra.mxu0 %v3041_v62 }
 0xdc1   :  { %2787 = vmatprep.subr.bf16.mxu0 %v2924_v0 }
 0xdc3   :  { %v2867_v26 = vpop.eup %2866 }
 0xdc4   :  { %1119 = vrot.lane.b32.xlu0 %v2867_v26, %s2928_s0 }
 0xe36   :  { %v1120_v27 = vpop.permute.xlu0 %1119 }
 0xe37   :  { %v1122_v29 = vmul.f32 %v1120_v27, %v1117_v24 }
 0xe39   :  { %v3216_v30 = vadd.f32 %v1123_v28, %v1122_v29 }
 0xe3b   :  { %v1229_v31 = vsel %vm122_vm3, %v1227_v22, %v3216_v30 }
 0xe3c   :  { %2527 = vmatmul.mubr.msk.f32.vlgmr.msra.gmra.mrb[12].mxu1 %vm407_vm4, %v1229_v31 }
 0xe3d   :  { %2771 = vmatpush3.bf16.msra.mxu1 %v2976_v8  ;;  %2567 = vmatprep.mubr.msk.f32.mxu1 %vm2925_vm0, %v2926_v1 }
 0xe3e   :  { %2772 = vmatprep.subr.bf16.mxu1 %v2924_v0 }
 0xe41   :  { %2774 = vmatpush3.bf16.msra.mxu1 %v2980_v10 }
 0xe42   :  { %2775 = vmatprep.subr.bf16.mxu1 %v2924_v0 }
 0xe86   :  { %v1394_v32 = vpop.f32.mrb[12].mxu0 }
 0xe87   :  { %v1395_v34 = vadd.f32 %v1394_v32, %v3007_v20  ;;  %v2539_v35 = vpop.f32.mrb[13].mxu0 }
 0xe89   :  { %v1399_v36 = vrot.slane %v1395_v34, 6 }
 0xe8b   :  { %1406 = vrot.lane.b32.xlu1 %v1399_v36, %s2927_s7  ;;  %v1401_v37 = vadd.f32 %v1399_v36, %v3003_v17 }
 0xe8d   :  { %v1402_v38 = vmul.f32 0.5, %v1401_v37 }
 0xe8f   :  { %2868 = vtanh.f32 %v1402_v38 }
 0xe99   :  { %v2869_v39 = vpop.eup %2868 }
 0xe9a   :  { %v1404_v40 = vmul.f32 0.5, %v2869_v39 }
 0xe9c   :  { %v1405_v41 = vadd.f32 0.5, %v1404_v40 }
 0xe9e   :  { %v1416_v60 = vsub.f32 1.0, %v1405_v41  ;;  %v1424_v63 = vmul.f32 %v1422_v57, %v1405_v41 }
 0xefd   :  { %v1407_v42 = vpop.permute.xlu1 %1406 }
 0xefe   :  { %v1409_v43 = vmul.f32 %v1407_v42, %v1405_v41 }
 0xf00   :  { %1411 = vrot.lane.b32.xlu0 %v1409_v43, %s2927_s7 }
 0xf0f   :  { %v1299_v14 = vpop.f32.mrb[12].mxu1 }
 0xf10   :  { %v1300_v44 = vadd.f32 %v1299_v14, %v3075_v33  ;;  %v2528_v45 = vpop.f32.mrb[13].mxu1 }
 0xf12   :  { %1308 = vrot.lane.b32.xlu0 %v1300_v44, %s2929_s10  ;;  %v1303_v46 = vmul.f32 0.5, %v1300_v44 }
 0xf14   :  { %2870 = vtanh.f32 %v1303_v46 }
 0xf1e   :  { %v2871_v49 = vpop.eup %2870 }
 0xf1f   :  { %v1305_v51 = vmul.f32 0.5, %v2871_v49 }
 0xf21   :  { %v1306_v53 = vadd.f32 0.5, %v1305_v51 }
 0xf23   :  { %v1318_v11 = vsub.f32 1.0, %v1306_v53  ;;  %v1324_v15 = vmul.f32 %v1306_v53, %v3216_v30 }
 0xf72   :  { %v1412_v47 = vpop.permute.xlu0 %1411 }
 0xf73   :  { %v1414_v48 = vadd.f32 %v1412_v47, %v3003_v17 }
 0xf75   :  { %2872 = vtanh.f32 %v1414_v48 }
 0xf7f   :  { %v2873_v50 = vpop.eup %2872 }
 0xf80   :  { %1418 = vrot.lane.b32.xlu1 %v2873_v50, %s2928_s0 }
 0xf84   :  { %v1309_v54 = vpop.permute.xlu0 %1308 }
 0xf85   :  { %v1311_v55 = vmul.f32 %v1309_v54, %v1306_v53 }
 0xf87   :  { %1313 = vrot.lane.b32.xlu0 %v1311_v55, %s2927_s7 }
 0xff2   :  { %v1419_v61 = vpop.permute.xlu1 %1418 }
 0xff3   :  { %v1421_v2 = vmul.f32 %v1419_v61, %v1416_v60 }
 0xff5   :  { %v3237_v3 = vadd.f32 %v1424_v63, %v1421_v2 }
 0xff7   :  { %1427 = vrot.lane.b32.xlu0 %v3237_v3, %s2928_s0  ;;  %v1531_v4 = vrot.slane %v3237_v3, 2  ;;  %v1630_v49 = vrot.slane %v3237_v3, 6 }
 0xff9   :  { %1532 = vrot.lane.b32.xlu1 %v1531_v4, %s2928_s0  ;;  %v1314_v5 = vpop.permute.xlu0 %1313 }
 0xffa   :  { %v1316_v6 = vadd.f32 %v1314_v5, %v1300_v44 }
 0xffc   :  { %2874 = vtanh.f32 %v1316_v6 }
0x1006   :  { %v2875_v7 = vpop.eup %2874 }
0x1007   :  { %1320 = vrot.lane.b32.xlu1 %v2875_v7, %s2928_s0 }
0x1069   :  { %v1428_v21 = vpop.permute.xlu0 %1427 }
0x106b   :  { %v1533_v58 = vpop.permute.xlu1 %1532 }
0x106c   :  { %2568 = vmatmul.mubr.msk.f32.vlgmr.msra.gmra.mrb[14].mxu1 %vm122_vm3, %v1533_v58 }
0x106d   :  { %2777 = vmatpush3.bf16.msra.mxu1 %v3027_v52  ;;  %2586 = vmatprep.mubr.msk.f32.mxu1 %vm2925_vm0, %v2926_v1 }
0x106e   :  { %2778 = vmatprep.subr.bf16.mxu1 %v2924_v0 }
0x1071   :  { %2780 = vmatpush3.bf16.msra.mxu1 %v3031_v56 }
0x1072   :  { %2781 = vmatprep.subr.bf16.mxu1 %v2924_v0 }
0x1075   :  { %2783 = vmatpush3.bf16.msra.mxu1 %v3037_v59 }
0x1076   :  { %2784 = vmatprep.subr.bf16.mxu1 %v2924_v0 }
0x1079   :  { %v1321_v13 = vpop.permute.xlu1 %1320  ;;  %2786 = vmatpush3.bf16.msra.mxu1 %v3041_v62 }
0x107a   :  { %v1323_v16 = vmul.f32 %v1321_v13, %v1318_v11  ;;  %2805 = vmatprep.subr.bf16.mxu1 %v2924_v0 }
0x107c   :  { %v1325_v18 = vadd.f32 %v1324_v15, %v1323_v16 }
0x107e   :  { %v1431_v19 = vrot.slane %v1325_v18, 6 }
0x1080   :  { %v1433_v22 = vsel %vm122_vm3, %v1428_v21, %v1431_v19 }
0x1081   :  { %v1435_v23 = vrot.slane %v1433_v22, 2 }
0x1083   :  { %2557 = vmatmul.mubr.msk.f32.vlgmr.msra.gmra.mrb[14].mxu0 %vm407_vm4, %v1435_v23 }
0x1084   :  { %2789 = vmatpush3.bf16.msra.mxu0 %v2976_v8  ;;  %2597 = vmatprep.mubr.msk.f32.mxu0 %vm2925_vm0, %v2926_v1 }
0x1085   :  { %2790 = vmatprep.subr.bf16.mxu0 %v2924_v0 }
0x1088   :  { %2792 = vmatpush3.bf16.msra.mxu0 %v2980_v10 }
0x1089   :  { %2793 = vmatprep.subr.bf16.mxu0 %v2924_v0 }
0x113f   :  { %v1602_v25 = vpop.f32.mrb[14].mxu1 }
0x1140   :  { %v1603_v26 = vadd.f32 %v1602_v25, %v3007_v20  ;;  %v2569_v24 = vpop.f32.mrb[15].mxu1 }
0x1142   :  { %v1607_v27 = vrot.slane %v1603_v26, 4 }
0x1144   :  { %1614 = vrot.lane.b32.xlu1 %v1607_v27, %s2927_s7  ;;  %v1609_v30 = vadd.f32 %v1607_v27, %v3003_v17 }
0x1146   :  { %v1610_v31 = vmul.f32 0.5, %v1609_v30 }
0x1148   :  { %2876 = vtanh.f32 %v1610_v31 }
0x1152   :  { %v2877_v10 = vpop.eup %2876 }
0x1153   :  { %v1612_v32 = vmul.f32 0.5, %v2877_v10 }
0x1155   :  { %v1613_v35 = vadd.f32 0.5, %v1612_v32 }
0x1156   :  { %v1504_v28 = vpop.f32.mrb[14].mxu0 }
0x1157   :  { %v1505_v29 = vadd.f32 %v1504_v28, %v3075_v33  ;;  %v2558_v8 = vpop.f32.mrb[15].mxu0  ;;  %v1624_v48 = vsub.f32 1.0, %v1613_v35  ;;  %v1632_v51 = vmul.f32 %v1630_v49, %v1613_v35 }
0x1159   :  { %1513 = vrot.lane.b32.xlu1 %v1505_v29, %s2929_s10  ;;  %v1508_v34 = vmul.f32 0.5, %v1505_v29 }
0x115b   :  { %2878 = vtanh.f32 %v1508_v34 }
0x1165   :  { %v2879_v38 = vpop.eup %2878 }
0x1166   :  { %v1510_v39 = vmul.f32 0.5, %v2879_v38 }
0x1168   :  { %v1511_v40 = vadd.f32 0.5, %v1510_v39 }
0x116a   :  { %v1523_v60 = vsub.f32 1.0, %v1511_v40  ;;  %v1529_v63 = vmul.f32 %v1511_v40, %v1325_v18 }
0x11b6   :  { %v1615_v36 = vpop.permute.xlu1 %1614 }
0x11b7   :  { %v1617_v37 = vmul.f32 %v1615_v36, %v1613_v35 }
0x11b9   :  { %1619 = vrot.lane.b32.xlu0 %v1617_v37, %s2927_s7 }
0x11cb   :  { %v1514_v41 = vpop.permute.xlu1 %1513 }
0x11cc   :  { %v1516_v42 = vmul.f32 %v1514_v41, %v1511_v40 }
0x11ce   :  { %1518 = vrot.lane.b32.xlu1 %v1516_v42, %s2927_s7 }
0x122b   :  { %v1620_v43 = vpop.permute.xlu0 %1619 }
0x122c   :  { %v1622_v14 = vadd.f32 %v1620_v43, %v3003_v17 }
0x122e   :  { %2880 = vtanh.f32 %v1622_v14 }
0x1238   :  { %v2881_v44 = vpop.eup %2880 }
0x1239   :  { %1626 = vrot.lane.b32.xlu0 %v2881_v44, %s2928_s0 }
0x1240   :  { %v1519_v45 = vpop.permute.xlu1 %1518 }
0x1241   :  { %v1521_v46 = vadd.f32 %v1519_v45, %v1505_v29 }
0x1243   :  { %2882 = vtanh.f32 %v1521_v46 }
0x124d   :  { %v2883_v47 = vpop.eup %2882 }
0x124e   :  { %1525 = vrot.lane.b32.xlu1 %v2883_v47, %s2928_s0 }
0x12ab   :  { %v1627_v50 = vpop.permute.xlu0 %1626 }
0x12ac   :  { %v1629_v53 = vmul.f32 %v1627_v50, %v1624_v48 }
0x12ae   :  { %v3275_v54 = vadd.f32 %v1632_v51, %v1629_v53 }
0x12b0   :  { %v1739_v55 = vrot.slane %v3275_v54, 4  ;;  %v1838_v35 = vrot.slane %v3275_v54, 6 }
0x12b2   :  { %1740 = vrot.lane.b32.xlu0 %v1739_v55, %s2928_s0 }
0x12b6   :  { %1635 = vrot.lane.b32.xlu0 %v3275_v54, %s2928_s0 }
0x12c0   :  { %v1526_v57 = vpop.permute.xlu1 %1525 }
0x12c1   :  { %v1528_v61 = vmul.f32 %v1526_v57, %v1523_v60 }
0x12c3   :  { %v3281_v2 = vadd.f32 %v1529_v63, %v1528_v61  ;;  %v1951_v63 = vld [vmem:[#allocation2 + $0xb8] sm:$0xff] }
0x12c5   :  { %v1639_v3 = vrot.slane %v3281_v2, 4 }
0x1324   :  { %v1741_v4 = vpop.permute.xlu0 %1740 }
0x1325   :  { %2598 = vmatmul.mubr.msk.f32.vlgmr.msra.gmra.mrb[16].mxu0 %vm122_vm3, %v1741_v4  ;;  %v1953_v4 = vld [vmem:[#allocation2 + $0xc8] sm:$0xff] }
0x1326   :  { %2795 = vmatpush3.bf16.msra.mxu0 %v3027_v52  ;;  %2616 = vmatprep.mubr.msk.f32.mxu0 %vm2925_vm0, %v2926_v1 }
0x1327   :  { %2796 = vmatprep.subr.bf16.mxu0 %v2924_v0 }
0x1328   :  { %v1636_v5 = vpop.permute.xlu0 %1635 }
0x1329   :  { %v1641_v6 = vsel %vm122_vm3, %v1636_v5, %v1639_v3 }
0x132a   :  { %v1643_v7 = vrot.slane %v1641_v6, 4  ;;  %2798 = vmatpush3.bf16.msra.mxu0 %v3031_v56 }
0x132b   :  { %2799 = vmatprep.subr.bf16.mxu0 %v2924_v0 }
0x132c   :  { %2587 = vmatmul.mubr.msk.f32.vlgmr.msra.gmra.mrb[16].mxu1 %vm407_vm4, %v1643_v7 }
0x132d   :  { %2627 = vmatprep.mubr.msk.f32.mxu1 %vm2925_vm0, %v2926_v1 }
0x132e   :  { %2801 = vmatpush3.bf16.msra.mxu0 %v3037_v59 }
0x132f   :  { %2802 = vmatprep.subr.bf16.mxu0 %v2924_v0 }
0x1332   :  { %2804 = vmatpush3.bf16.msra.mxu0 %v3041_v62 }
0x1333   :  { %2817 = vmatprep.subr.bf16.mxu0 %v2924_v0 }
0x13f8   :  { %v1810_v52 = vpop.f32.mrb[16].mxu0 }
0x13f9   :  { %v1811_v58 = vadd.f32 %v1810_v52, %v3007_v20  ;;  %v2599_v11 = vpop.f32.mrb[17].mxu0 }
0x13fb   :  { %v1815_v56 = vrot.slane %v1811_v58, 2 }
0x13fd   :  { %1822 = vrot.lane.b32.xlu1 %v1815_v56, %s2927_s7  ;;  %v1817_v59 = vadd.f32 %v1815_v56, %v3003_v17 }
0x13ff   :  { %v1712_v13 = vpop.f32.mrb[16].mxu1  ;;  %v1818_v18 = vmul.f32 0.5, %v1817_v59  ;;  %v120_v59 = vsub.s32 1, %v2994_v12 }
0x1400   :  { %v1713_v15 = vadd.f32 %v1712_v13, %v3075_v33  ;;  %v2588_v16 = vpop.f32.mrb[17].mxu1  ;;  %v1947_v13 = vld [vmem:[#allocation2 + $0x98] sm:$0xff] }
0x1401   :  { %2884 = vtanh.f32 %v1818_v18  ;;  %v1949_v18 = vld [vmem:[#allocation2 + $0xa8] sm:$0xff] }
0x1402   :  { %1721 = vrot.lane.b32.xlu0 %v1713_v15, %s2929_s10  ;;  %v1716_v62 = vmul.f32 0.5, %v1713_v15 }
0x1404   :  { %2886 = vtanh.f32 %v1716_v62  ;;  %v1950_v62 = vld [vmem:[#allocation2 + $0xb0] sm:$0xff] }
0x140b   :  { %v2885_v19 = vpop.eup %2884 }
0x140c   :  { %v1820_v21 = vmul.f32 0.5, %v2885_v19 }
0x140e   :  { %v2887_v22 = vpop.eup %2886  ;;  %v1821_v20 = vadd.f32 0.5, %v1820_v21  ;;  %v2815_v21 = vpack.c.bf16 %v1950_v62, %v1949_v18 }
0x140f   :  { %v1718_v25 = vmul.f32 0.5, %v2887_v22  ;;  %v2896_v22 = vld [vmem:[%s3343_s3] sm:$0xff] }
0x1410   :  { %v1832_v34 = vsub.f32 1.0, %v1821_v20  ;;  %v1840_v37 = vmul.f32 %v1838_v35, %v1821_v20 }
0x1411   :  { %v1719_v24 = vadd.f32 0.5, %v1718_v25  ;;  %v2109_v25 = vld [vmem:[#allocation2 + $0xd8] sm:$0xff] }
0x1413   :  { %v1731_v40 = vsub.f32 1.0, %v1719_v24  ;;  %v1737_v42 = vmul.f32 %v1719_v24, %v3281_v2  ;;  %v1952_v2 = vld [vmem:[#allocation2 + $0xc0] sm:$0xff] }
0x1414   :  { %v2806_v3 = vpack.c.bf16 %v1952_v2, %v1951_v63 }
0x1416   :  { %2807 = vmatpush3.bf16.msra.mxu1 %v2806_v3 }
0x1417   :  { %2808 = vmatprep.subr.bf16.mxu1 %v2924_v0 }
0x146f   :  { %v1823_v23 = vpop.permute.xlu1 %1822 }
0x1470   :  { %v1825_v26 = vmul.f32 %v1823_v23, %v1821_v20  ;;  %v121_v20 = vrot.slane %v2896_v22, %v120_v59 }
0x1472   :  { %1827 = vrot.lane.b32.xlu1 %v1825_v26, %s2927_s7  ;;  %v193_v23 = vadd.f32 %v3066_v9, %v121_v20  ;;  %v2110_v26 = vld [vmem:[#allocation2 + $0xe0] sm:$0xff] }
0x1474   :  { %v1722_v27 = vpop.permute.xlu0 %1721 }
0x1475   :  { %v1724_v28 = vmul.f32 %v1722_v27, %v1719_v24  ;;  %v2818_v24 = vpack.c.bf16 %v2110_v26, %v2109_v25  ;;  %v2111_v27 = vld [vmem:[#allocation2 + $0xe8] sm:$0xff] }
0x1477   :  { %1726 = vrot.lane.b32.xlu0 %v1724_v28, %s2927_s7 }
0x14e4   :  { %v1828_v29 = vpop.permute.xlu1 %1827 }
0x14e5   :  { %v1830_v8 = vadd.f32 %v1828_v29, %v3003_v17 }
0x14e7   :  { %2888 = vtanh.f32 %v1830_v8 }
0x14e9   :  { %v1727_v30 = vpop.permute.xlu0 %1726 }
0x14ea   :  { %v1729_v31 = vadd.f32 %v1727_v30, %v1713_v15  ;;  %v1948_v15 = vld [vmem:[#allocation2 + $0xa0] sm:$0xff]  ;;  %v2105_v30 = vsub.s32 5, %v2994_v12 }
0x14eb   :  { %v2812_v16 = vpack.c.bf16 %v1948_v15, %v1947_v13 }
0x14ec   :  { %2890 = vtanh.f32 %v1729_v31  ;;  %v2106_v31 = vrot.slane %v2896_v22, %v2105_v30 }
0x14f1   :  { %v2889_v10 = vpop.eup %2888 }
0x14f2   :  { %1834 = vrot.lane.b32.xlu1 %v2889_v10, %s2928_s0 }
0x14f6   :  { %v2891_v32 = vpop.eup %2890 }
0x14f7   :  { %1733 = vrot.lane.b32.xlu0 %v2891_v32, %s2928_s0 }
0x1564   :  { %v1835_v36 = vpop.permute.xlu1 %1834 }
0x1565   :  { %v1837_v38 = vmul.f32 %v1835_v36, %v1832_v34  ;;  %v2115_v36 = vsub.s32 6, %v2994_v12 }
0x1567   :  { %v1841_v39 = vadd.f32 %v1840_v37, %v1837_v38  ;;  %v2116_v37 = vrot.slane %v2896_v22, %v2115_v36 }
0x1569   :  { %1843 = vrot.lane.b32.xlu1 %v1841_v39, %s2928_s0  ;;  %v1734_v17 = vpop.permute.xlu0 %1733 }
0x156a   :  { %v1736_v41 = vmul.f32 %v1734_v17, %v1731_v40 }
0x156c   :  { %v1738_v43 = vadd.f32 %v1737_v42, %v1736_v41 }
0x156e   :  { %v1847_v14 = vrot.slane %v1738_v43, 2 }
0x15db   :  { %v1844_v44 = vpop.permute.xlu1 %1843 }
0x15dc   :  { %v1849_v45 = vsel %vm122_vm3, %v1844_v44, %v1847_v14 }
0x15dd   :  { %v1851_v46 = vrot.slane %v1849_v45, 6 }
0x15df   :  { %2617 = vmatmul.mubr.msk.f32.vlgmr.msra.gmra.mrb[18].mxu0 %vm407_vm4, %v1851_v46 }
0x15e0   :  { %2649 = vmatprep.mubr.msk.f32.mxu0 %vm2925_vm0, %v2926_v1  ;;  %2819 = vmatpush3.bf16.msra.mxu0 %v2818_v24 }
0x15e1   :  { %2820 = vmatprep.subr.bf16.mxu0 %v2924_v0 }
0x16b2   :  { %v1920_v47 = vpop.f32.mrb[18].mxu0 }
0x16b3   :  { %v1921_v48 = vadd.f32 %v1920_v47, %v3075_v33  ;;  %v2618_v49 = vpop.f32.mrb[19].mxu0  ;;  %v1954_v33 = vld [vmem:[#allocation2 + $0xd0] sm:$0xff] }
0x16b4   :  { %v2809_v5 = vpack.c.bf16 %v1954_v33, %v1953_v4 }
0x16b5   :  { %1929 = vrot.lane.b32.xlu0 %v1921_v48, %s2929_s10  ;;  %v1924_v50 = vmul.f32 0.5, %v1921_v48 }
0x16b6   :  { %2810 = vmatpush3.bf16.msra.mxu1 %v2809_v5 }
0x16b7   :  { %2892 = vtanh.f32 %v1924_v50  ;;  %2811 = vmatprep.subr.bf16.mxu1 %v2924_v0 }
0x16c1   :  { %v2893_v51 = vpop.eup %2892 }
0x16c2   :  { %v1926_v53 = vmul.f32 0.5, %v2893_v51 }
0x16c4   :  { %v1927_v54 = vadd.f32 0.5, %v1926_v53 }
0x16c6   :  { %v1939_v7 = vsub.f32 1.0, %v1927_v54  ;;  %v1945_v58 = vmul.f32 %v1927_v54, %v1738_v43 }
0x1727   :  { %v1930_v55 = vpop.permute.xlu0 %1929 }
0x1728   :  { %v1932_v57 = vmul.f32 %v1930_v55, %v1927_v54 }
0x172a   :  { %1934 = vrot.lane.b32.xlu1 %v1932_v57, %s2927_s7 }
0x179c   :  { %v1935_v60 = vpop.permute.xlu1 %1934 }
0x179d   :  { %v1937_v61 = vadd.f32 %v1935_v60, %v1921_v48 }
0x179f   :  { %2894 = vtanh.f32 %v1937_v61 }
0x17a9   :  { %v2895_v6 = vpop.eup %2894 }
0x17aa   :  { %1941 = vrot.lane.b32.xlu0 %v2895_v6, %s2928_s0 }
0x181c   :  { %v1942_v52 = vpop.permute.xlu0 %1941 }
0x181d   :  { %v1944_v11 = vmul.f32 %v1942_v52, %v1939_v7 }
0x181f   :  { %v1946_v56 = vadd.f32 %v1945_v58, %v1944_v11 }
0x1821   :  { %1956 = vrot.lane.b32.xlu1 %v1946_v56, %s2928_s0 }
0x1893   :  { %v1957_v19 = vpop.permute.xlu1 %1956 }
0x1894   :  { %2628 = vmatmul.mubr.msk.f32.vlgmr.msra.gmra.mrb[18].mxu1 %vm122_vm3, %v1957_v19 }
0x1895   :  { %2813 = vmatpush3.bf16.msra.mxu1 %v2812_v16  ;;  %2638 = vmatprep.mubr.msk.f32.mxu1 %vm2925_vm0, %v2926_v1  ;;  %v2112_v1 = vld [vmem:[#allocation2 + $0xf0] sm:$0xff] }
0x1896   :  { %2814 = vmatprep.subr.bf16.mxu1 %v2924_v0  ;;  %v2821_v28 = vpack.c.bf16 %v2112_v1, %v2111_v27 }
0x1898   :  { %2822 = vmatpush3.bf16.msra.mxu0 %v2821_v28 }
0x1899   :  { %2816 = vmatpush3.bf16.msra.mxu1 %v2815_v21 }
0x189c   :  { %2639 = vmatmul.mubr.msk.f32.vlgmr.msra.gmra.mrb[20].mxu1 %vm122_vm3, %v193_v23 }
0x1967   :  { %v2026_v29 = vpop.f32.mrb[18].mxu1 }
0x1968   :  { %v2629_v8 = vpop.f32.mrb[19].mxu1 }
0x196f   :  { %v2099_v10 = vpop.f32.mrb[20].mxu1 }
0x1970   :  { %v2100_v32 = vadd.f32 %v2099_v10, %v2026_v29  ;;  %v2640_v9 = vpop.f32.mrb[21].mxu1 }
0x1972   :  { %v2107_v34 = vadd.f32 %v2106_v31, %v2100_v32 }
0x1974   :  { %v2108_v35 = vmax.f32 %v2107_v34, 0.0 }
0x1976   :  { %2650 = vmatmul.mubr.msk.f32.vlgmr.msra.gmra.mrb[20].mxu0 %vm122_vm3, %v2108_v35 }
0x1a49   :  { %v2186_v0 = vpop.f32.mrb[20].mxu0 }
0x1a4a   :  { %v2187_v38 = vadd.f32 %v2186_v0, %v2116_v37  ;;  %v2651_v39 = vpop.f32.mrb[21].mxu0 }
0x1a4c   :  { %2190 = vst [vmem:[%s3344_s4] sm:$0x3] %v2187_v38 }
0x1a4d   :  { %2195 = vsyncpa [#allocation3], 1 }

</bundles_post_ra>
